<compile_context>
chip_gen: v6e
topology: v6e:2x2x1
jax: 0.10.0
libtpu: 0.0.40
codegen_flags: <defaults>
</compile_context>

<pallas_src>
import functools
import math

import jax
import jax.numpy as jnp
from jax.experimental import pallas as pl
from jax.experimental.pallas import tpu as pltpu


# ----------------------------------------------------------------------------
# RoPE tables (parameter setup, plain JAX — mirrors precompute_rope_params)
# ----------------------------------------------------------------------------
def precompute_rope_params(head_dim, theta_base=500000.0, context_length=8192):
    assert head_dim % 2 == 0
    inv_freq = 1.0 / theta_base ** (
        jnp.arange(0, head_dim, 2)[: head_dim // 2].astype(jnp.float32) / head_dim
    )
    positions = jnp.arange(context_length).astype(jnp.float32)
    angles = positions[:, None] * inv_freq[None, :]
    angles = jnp.concatenate([angles, angles], axis=1)  # (ctx, head_dim)
    return jnp.cos(angles), jnp.sin(angles)


# ----------------------------------------------------------------------------
# Fused decoder-block kernel (one grid step = one batch element)
# ----------------------------------------------------------------------------
def decoder_block_kernel(
    x_ref, enc_ref, norms_ref, mask_ref,
    sa_w_ref, sa_wo_ref, ca_wq_ref, ca_wkv_ref, ca_wo_ref,
    w12_ref, w3_ref,
    cosq_ref, sinq_ref, cosk_ref, sink_ref,
    o_ref,
    *, num_heads, eps):
    f32, bf16 = jnp.float32, jnp.bfloat16
    H = num_heads

    x = x_ref[0].astype(f32)          # (Sq, D)  residual stream, f32
    enc_b = enc_ref[0]                # (Skv, D) encoder input, already bf16
    sq, d = x.shape
    dh = d // H
    hidden = w3_ref.shape[0]

    cos_q = cosq_ref[...]             # (Sq, D)  per-head-tiled tables
    sin_q = sinq_ref[...]
    cos_k = cosk_ref[...]             # (Skv, D)
    sin_k = sink_ref[...]

    def rmsnorm(v, w):                # v: (S, D) f32 ; w: (1, D) f32
        ms = jnp.mean(v * v, axis=-1, keepdims=True)
        return v * jax.lax.rsqrt(ms + eps) * w

    def split_heads(t2d):
        # (S, D) -> (H, S, dh). Static lane slices stacked on a new leading
        # axis — pure layout plumbing, no compute.
        return jnp.stack([t2d[:, h * dh:(h + 1) * dh] for h in range(H)], axis=0)

    def merge_heads(t3d):
        # (H, S, dh) -> (S, D)
        return jnp.concatenate([t3d[h] for h in range(H)], axis=-1)

    def attention(q2d, k2d, v2d, wo_ref, bias):
        # q2d: (Sq, D) f32 (RoPE'd, scale folded); k2d/v2d: (Skv, D) f32.
        qh = split_heads(q2d.astype(bf16))          # (H, Sq, dh)
        kh = split_heads(k2d.astype(bf16))          # (H, Skv, dh)
        vh = split_heads(v2d.astype(bf16))          # (H, Skv, dh)

        s = jnp.einsum('hqd,hkd->hqk', qh, kh,
                       preferred_element_type=f32)  # (H, Sq, Skv)
        if bias is not None:
            s = s + bias[None]                      # (1,Sq,Skv) additive mask

        m = jnp.max(s, axis=-1, keepdims=True)
        p = jnp.exp(s - m)
        l = jnp.sum(p, axis=-1, keepdims=True)
        ctx = jnp.einsum('hqk,hkd->hqd', p.astype(bf16), vh,
                         preferred_element_type=f32)        # (H, Sq, dh)
        # normalize AFTER P@V: scales Sq*dh, not Sq*Skv, elements (EUP recip).
        ctx = ctx * pl.reciprocal(l, approx=True)
        ctx2d = merge_heads(ctx).astype(bf16)                # (Sq, D)
        return jnp.dot(ctx2d, wo_ref[...], preferred_element_type=f32)

    # ---------------- self-attention (causal) + residual ----------------
    hn = rmsnorm(x, norms_ref[0:1, :]).astype(bf16)
    proj = jnp.dot(hn, sa_w_ref[...], preferred_element_type=f32)  # (Sq, 5D)
    q2d = proj[:, 0 * d:1 * d] * cos_q + proj[:, 1 * d:2 * d] * sin_q
    k2d = proj[:, 2 * d:3 * d] * cos_q + proj[:, 3 * d:4 * d] * sin_q
    v2d = proj[:, 4 * d:5 * d]
    x = x + attention(q2d, k2d, v2d, sa_wo_ref, mask_ref[...])

    # ------------ cross-attention (non-causal, KV = encoder) ------------
    hn = rmsnorm(x, norms_ref[1:2, :]).astype(bf16)
    qproj = jnp.dot(hn, ca_wq_ref[...], preferred_element_type=f32)    # (Sq, 2D)
    kvproj = jnp.dot(enc_b, ca_wkv_ref[...], preferred_element_type=f32)  # (Skv, 3D)
    q2d = qproj[:, 0 * d:1 * d] * cos_q + qproj[:, 1 * d:2 * d] * sin_q
    k2d = kvproj[:, 0 * d:1 * d] * cos_k + kvproj[:, 1 * d:2 * d] * sin_k
    v2d = kvproj[:, 2 * d:3 * d]
    x = x + attention(q2d, k2d, v2d, ca_wo_ref, None)

    # ------------------------ SwiGLU FFN + residual ----------------------
    hn = rmsnorm(x, norms_ref[2:3, :]).astype(bf16)
    ab = jnp.dot(hn, w12_ref[...], preferred_element_type=f32)     # (Sq, 2*hid)
    a = ab[:, :hidden]
    gate = ab[:, hidden:]
    g = (a * jax.nn.sigmoid(a) * gate).astype(bf16)                # silu(a)*b
    ff = jnp.dot(g, w3_ref[...], preferred_element_type=f32)
    o_ref[0] = (x + ff).astype(o_ref.dtype)


# ----------------------------------------------------------------------------
# Wrapper: weight fusion / re-layout + single pallas_call over the batch
# ----------------------------------------------------------------------------
def llama_decoder_block(x, encoder_input, params, num_heads, eps=1e-5):
    b, sq, d = x.shape
    skv = encoder_input.shape[1]
    dh = d // num_heads
    half = dh // 2
    hidden = params["ff_w1"].shape[1]
    scale = 1.0 / math.sqrt(dh)
    f32, bf16 = jnp.float32, jnp.bfloat16

    # rotate-half as a right-multiplication: (q @ rm) == concat([-q2, q1]).
    rm = jnp.zeros((dh, dh), f32)
    rm = rm.at[jnp.arange(half) + half, jnp.arange(half)].set(-1.0)
    rm = rm.at[jnp.arange(half), jnp.arange(half) + half].set(1.0)
    r_full = jnp.kron(jnp.eye(num_heads, dtype=f32), rm)          # (D, D)

    wq_s = params["sa_wq"].astype(f32) * scale                    # fold 1/sqrt(dh)
    wk_s = params["sa_wk"].astype(f32)
    sa_w = jnp.concatenate(
        [wq_s, wq_s @ r_full, wk_s, wk_s @ r_full, params["sa_wv"].astype(f32)],
        axis=1).astype(bf16)                                      # (D, 5D)
    sa_wo = params["sa_wo"].astype(bf16)                          # (D, D)

    cq_s = params["ca_wq"].astype(f32) * scale
    ck = params["ca_wk"].astype(f32)
    ca_wq = jnp.concatenate([cq_s, cq_s @ r_full], axis=1).astype(bf16)   # (D, 2D)
    ca_wkv = jnp.concatenate(
        [ck, ck @ r_full, params["ca_wv"].astype(f32)], axis=1).astype(bf16)  # (D, 3D)
    ca_wo = params["ca_wo"].astype(bf16)

    w12 = jnp.concatenate([params["ff_w1"], params["ff_w2"]], axis=1).astype(bf16)
    w3 = params["ff_w3"].astype(bf16)

    norms = jnp.stack([params["norm1_w"], params["norm_cross_w"],
                       params["norm2_w"]]).astype(f32)            # (3, D)

    # Per-head-tiled RoPE tables (cos/sin identical across heads).
    # kv_max_len / k_rope_base are None in the module -> K table == Q table.
    cos_q = jnp.tile(params["q_cos"][:sq], (1, num_heads)).astype(f32)   # (Sq, D)
    sin_q = jnp.tile(params["q_sin"][:sq], (1, num_heads)).astype(f32)
    cos_k = jnp.tile(params["q_cos"][:skv], (1, num_heads)).astype(f32)  # (Skv, D)
    sin_k = jnp.tile(params["q_sin"][:skv], (1, num_heads)).astype(f32)

    # Causal additive bias, computed once in the wrapper.
    row = jnp.arange(sq)[:, None]
    col = jnp.arange(sq)[None, :]
    causal_bias = jnp.where(col <= row, 0.0, -1e30).astype(f32)   # (Sq, Sq)

    enc_bf = encoder_input.astype(bf16)

    kernel = functools.partial(decoder_block_kernel,
                               num_heads=num_heads, eps=eps)

    batch3 = lambda s1, s2: pl.BlockSpec((1, s1, s2), lambda i: (i, 0, 0))
    full2 = lambda s1, s2: pl.BlockSpec((s1, s2), lambda i: (0, 0))

    return pl.pallas_call(
        kernel,
        out_shape=jax.ShapeDtypeStruct((b, sq, d), x.dtype),
        grid=(b,),
        in_specs=[
            batch3(sq, d),                 # x
            batch3(skv, d),                # encoder_input (bf16)
            full2(3, d),                   # stacked RMSNorm weights
            full2(sq, sq),                 # causal additive bias
            full2(d, 5 * d),               # self-attn fused Wq|WqR|Wk|WkR|Wv
            full2(d, d),                   # self-attn Wo
            full2(d, 2 * d),               # cross-attn Wq|WqR
            full2(d, 3 * d),               # cross-attn Wk|WkR|Wv
            full2(d, d),                   # cross-attn Wo
            full2(d, 2 * hidden),          # FFN w1||w2
            full2(hidden, d),              # FFN w3
            full2(sq, d), full2(sq, d),    # q-side RoPE (tiled)
            full2(skv, d), full2(skv, d),  # k-side RoPE for cross-attn (tiled)
        ],
        out_specs=batch3(sq, d),
        compiler_params=pltpu.CompilerParams(
            dimension_semantics=("parallel",),
            vmem_limit_bytes=32 * 1024 * 1024),
    )(x, enc_bf, norms, causal_bias,
      sa_w, sa_wo, ca_wq, ca_wkv, ca_wo, w12, w3,
      cos_q, sin_q, cos_k, sin_k)


# ----------------------------------------------------------------------------
# Pure-JAX reference (mirrors the PyTorch module, all f32)
# ----------------------------------------------------------------------------
def _ref_rmsnorm(x, w, eps=1e-5):
    ms = jnp.mean(x * x, axis=-1, keepdims=True)
    return x * jax.lax.rsqrt(ms + eps) * w


def _ref_rope(x, cos, sin):
    dh = x.shape[-1]
    x1, x2 = x[..., : dh // 2], x[..., dh // 2:]
    rot = jnp.concatenate([-x2, x1], axis=-1)
    return x * cos[None, None] + rot * sin[None, None]


def _ref_attention(xq, xkv, wq, wk, wv, wo, cos, sin, num_heads, causal):
    b, sq, d = xq.shape
    skv = xkv.shape[1]
    dh = d // num_heads

    def split(t):
        return t.reshape(b, -1, num_heads, dh).transpose(0, 2, 1, 3)

    q = _ref_rope(split(xq @ wq), cos[:sq], sin[:sq])
    k = _ref_rope(split(xkv @ wk), cos[:skv], sin[:skv])
    v = split(xkv @ wv)
    s = jnp.einsum('bhqd,bhkd->bhqk', q, k) / math.sqrt(dh)
    if causal:
        mask = jnp.tril(jnp.ones((sq, skv), bool))
        s = jnp.where(mask, s, -jnp.inf)
    p = jax.nn.softmax(s, axis=-1)
    o = jnp.einsum('bhqk,bhkd->bhqd', p, v)
    return o.transpose(0, 2, 1, 3).reshape(b, sq, d) @ wo


def ref_decoder_block(x, enc, params, num_heads):
    cos, sin = params["q_cos"], params["q_sin"]
    h = _ref_rmsnorm(x, params["norm1_w"])
    x = x + _ref_attention(h, h, params["sa_wq"], params["sa_wk"],
                           params["sa_wv"], params["sa_wo"],
                           cos, sin, num_heads, causal=True)
    h = _ref_rmsnorm(x, params["norm_cross_w"])
    x = x + _ref_attention(h, enc, params["ca_wq"], params["ca_wk"],
                           params["ca_wv"], params["ca_wo"],
                           cos, sin, num_heads, causal=False)
    h = _ref_rmsnorm(x, params["norm2_w"])
    g = jax.nn.silu(h @ params["ff_w1"]) * (h @ params["ff_w2"])
    return x + g @ params["ff_w3"]


# ----------------------------------------------------------------------------
# Main
# ----------------------------------------------------------------------------
if __name__ == "__main__":
    embedding_dim = 32
    num_heads = 4
    head_dim = embedding_dim // num_heads
    hidden_dim = 64
    q_max_len = 64
    rope_base = 500000.0

    batch = 2
    seq_q = 8          # decoder sequence
    seq_kv = 16        # encoder sequence

    key = jax.random.PRNGKey(0)
    ks = jax.random.split(key, 16)

    def w(k, shape):
        return jax.random.normal(k, shape, dtype=jnp.float32) * 0.05

    params = {
        "norm1_w": jnp.ones((embedding_dim,), jnp.float32),
        "norm_cross_w": jnp.ones((embedding_dim,), jnp.float32),
        "norm2_w": jnp.ones((embedding_dim,), jnp.float32),
        # projections stored (in_features, out_features): y = x @ W
        "sa_wq": w(ks[0], (embedding_dim, embedding_dim)),
        "sa_wk": w(ks[1], (embedding_dim, embedding_dim)),
        "sa_wv": w(ks[2], (embedding_dim, embedding_dim)),
        "sa_wo": w(ks[3], (embedding_dim, embedding_dim)),
        "ca_wq": w(ks[4], (embedding_dim, embedding_dim)),
        "ca_wk": w(ks[5], (embedding_dim, embedding_dim)),
        "ca_wv": w(ks[6], (embedding_dim, embedding_dim)),
        "ca_wo": w(ks[7], (embedding_dim, embedding_dim)),
        "ff_w1": w(ks[8], (embedding_dim, hidden_dim)),
        "ff_w2": w(ks[9], (embedding_dim, hidden_dim)),
        "ff_w3": w(ks[10], (hidden_dim, embedding_dim)),
    }
    q_cos, q_sin = precompute_rope_params(
        head_dim, theta_base=rope_base, context_length=q_max_len)
    params["q_cos"], params["q_sin"] = q_cos, q_sin

    x = jax.random.normal(ks[11], (batch, seq_q, embedding_dim), dtype=jnp.float32)
    encoder_input = jax.random.normal(
        ks[12], (batch, seq_kv, embedding_dim), dtype=jnp.float32)

    out = llama_decoder_block(x, encoder_input, params, num_heads)
    out = jax.block_until_ready(out)
    assert out.shape == (batch, seq_q, embedding_dim)
    assert bool(jnp.all(jnp.isfinite(out)))

    # correctness vs pure-JAX reference (kernel uses bf16 MXU operands).
    ref = ref_decoder_block(x, encoder_input, params, num_heads)
    max_err = float(jnp.max(jnp.abs(out - ref)))
    assert max_err < 5e-2, f"max abs err {max_err}"

    print("KERNEL_OK")
</pallas_src>

<mosaic_0001>
module attributes {stable_mosaic.version = 11 : i64} {
  func.func @decoder_block_kernel(%arg0: i32, %arg1: memref<1x8x32xf32, #tpu.memory_space<vmem>>, %arg2: memref<1x16x32xbf16, #tpu.memory_space<vmem>>, %arg3: memref<3x32xf32, #tpu.memory_space<vmem>>, %arg4: memref<8x8xf32, #tpu.memory_space<vmem>>, %arg5: memref<32x160xbf16, #tpu.memory_space<vmem>>, %arg6: memref<32x32xbf16, #tpu.memory_space<vmem>>, %arg7: memref<32x64xbf16, #tpu.memory_space<vmem>>, %arg8: memref<32x96xbf16, #tpu.memory_space<vmem>>, %arg9: memref<32x32xbf16, #tpu.memory_space<vmem>>, %arg10: memref<32x128xbf16, #tpu.memory_space<vmem>>, %arg11: memref<64x32xbf16, #tpu.memory_space<vmem>>, %arg12: memref<8x32xf32, #tpu.memory_space<vmem>>, %arg13: memref<8x32xf32, #tpu.memory_space<vmem>>, %arg14: memref<16x32xf32, #tpu.memory_space<vmem>>, %arg15: memref<16x32xf32, #tpu.memory_space<vmem>>, %arg16: memref<1x8x32xf32, #tpu.memory_space<vmem>>) attributes {dimension_semantics = [#tpu.dimension_semantics<parallel>], iteration_bounds = array<i64: 2>, scalar_prefetch = 0 : i64, scratch_operands = 0 : i64, tpu.core_type = #tpu.core_type<tc>, window_params = [{transform_indices = @transform_0, window_bounds = array<i64: 1, 8, 32>}, {transform_indices = @transform_1, window_bounds = array<i64: 1, 16, 32>}, {pipeline_mode = #tpu.pipeline_mode<synchronous>, transform_indices = @transform_2, window_bounds = array<i64: 3, 32>}, {pipeline_mode = #tpu.pipeline_mode<synchronous>, transform_indices = @transform_3, window_bounds = array<i64: 8, 8>}, {pipeline_mode = #tpu.pipeline_mode<synchronous>, transform_indices = @transform_4, window_bounds = array<i64: 32, 160>}, {pipeline_mode = #tpu.pipeline_mode<synchronous>, transform_indices = @transform_5, window_bounds = array<i64: 32, 32>}, {pipeline_mode = #tpu.pipeline_mode<synchronous>, transform_indices = @transform_6, window_bounds = array<i64: 32, 64>}, {pipeline_mode = #tpu.pipeline_mode<synchronous>, transform_indices = @transform_7, window_bounds = array<i64: 32, 96>}, {pipeline_mode = #tpu.pipeline_mode<synchronous>, transform_indices = @transform_8, window_bounds = array<i64: 32, 32>}, {pipeline_mode = #tpu.pipeline_mode<synchronous>, transform_indices = @transform_9, window_bounds = array<i64: 32, 128>}, {pipeline_mode = #tpu.pipeline_mode<synchronous>, transform_indices = @transform_10, window_bounds = array<i64: 64, 32>}, {pipeline_mode = #tpu.pipeline_mode<synchronous>, transform_indices = @transform_11, window_bounds = array<i64: 8, 32>}, {pipeline_mode = #tpu.pipeline_mode<synchronous>, transform_indices = @transform_12, window_bounds = array<i64: 8, 32>}, {pipeline_mode = #tpu.pipeline_mode<synchronous>, transform_indices = @transform_13, window_bounds = array<i64: 16, 32>}, {pipeline_mode = #tpu.pipeline_mode<synchronous>, transform_indices = @transform_14, window_bounds = array<i64: 16, 32>}, {transform_indices = @transform_15, window_bounds = array<i64: 1, 8, 32>}]} {
    %c0 = arith.constant 0 : index
    %c0_0 = arith.constant 0 : index
    %c0_1 = arith.constant 0 : index
    %0 = vector.load %arg1[%c0, %c0_0, %c0_1] : memref<1x8x32xf32, #tpu.memory_space<vmem>>, vector<1x8x32xf32>
    %1 = vector.shape_cast %0 : vector<1x8x32xf32> to vector<8x32xf32>
    %c0_2 = arith.constant 0 : index
    %c0_3 = arith.constant 0 : index
    %c0_4 = arith.constant 0 : index
    %2 = vector.load %arg2[%c0_2, %c0_3, %c0_4] : memref<1x16x32xbf16, #tpu.memory_space<vmem>>, vector<1x16x32xbf16>
    %3 = vector.shape_cast %2 : vector<1x16x32xbf16> to vector<16x32xbf16>
    %c0_5 = arith.constant 0 : index
    %c0_6 = arith.constant 0 : index
    %4 = vector.load %arg12[%c0_5, %c0_6] : memref<8x32xf32, #tpu.memory_space<vmem>>, vector<8x32xf32>
    %c0_7 = arith.constant 0 : index
    %c0_8 = arith.constant 0 : index
    %5 = vector.load %arg13[%c0_7, %c0_8] : memref<8x32xf32, #tpu.memory_space<vmem>>, vector<8x32xf32>
    %c0_9 = arith.constant 0 : index
    %c0_10 = arith.constant 0 : index
    %6 = vector.load %arg14[%c0_9, %c0_10] : memref<16x32xf32, #tpu.memory_space<vmem>>, vector<16x32xf32>
    %c0_11 = arith.constant 0 : index
    %c0_12 = arith.constant 0 : index
    %7 = vector.load %arg15[%c0_11, %c0_12] : memref<16x32xf32, #tpu.memory_space<vmem>>, vector<16x32xf32>
    %c0_13 = arith.constant 0 : index
    %c0_14 = arith.constant 0 : index
    %8 = vector.load %arg3[%c0_13, %c0_14] : memref<3x32xf32, #tpu.memory_space<vmem>>, vector<1x32xf32>
    %9 = arith.mulf %1, %1 : vector<8x32xf32>
    %cst = arith.constant dense<0.000000e+00> : vector<8xf32>
    %10 = vector.multi_reduction <add>, %9, %cst [1] : vector<8x32xf32> to vector<8xf32>
    %11 = vector.shape_cast %10 : vector<8xf32> to vector<8x1xf32>
    %cst_15 = arith.constant 3.200000e+01 : f32
    %12 = vector.broadcast %cst_15 : f32 to vector<8x1xf32>
    %13 = arith.divf %11, %12 : vector<8x1xf32>
    %cst_16 = arith.constant 9.99999974E-6 : f32
    %14 = vector.broadcast %cst_16 : f32 to vector<8x1xf32>
    %15 = arith.addf %13, %14 : vector<8x1xf32>
    %16 = math.rsqrt %15 : vector<8x1xf32>
    %17 = vector.broadcast %16 : vector<8x1xf32> to vector<8x32xf32>
    %18 = arith.mulf %1, %17 : vector<8x32xf32>
    %19 = vector.broadcast %8 : vector<1x32xf32> to vector<8x32xf32>
    %20 = arith.mulf %18, %19 : vector<8x32xf32>
    %21 = arith.truncf %20 : vector<8x32xf32> to vector<8x32xbf16>
    %c0_17 = arith.constant 0 : index
    %c0_18 = arith.constant 0 : index
    %22 = vector.load %arg5[%c0_17, %c0_18] : memref<32x160xbf16, #tpu.memory_space<vmem>>, vector<32x160xbf16>
    %cst_19 = arith.constant dense<0.000000e+00> : vector<8x160xf32>
    %23 = tpu.matmul %21, %22, %cst_19 {dimension_numbers = #tpu.dot_dimension_numbers<[1], [0], [0], [1], [0, 0, 1, 1], [], []>} : vector<8x32xbf16>, vector<32x160xbf16>, vector<8x160xf32> -> vector<8x160xf32>
    %24 = vector.extract_strided_slice %23 {offsets = [0, 0], sizes = [8, 32], strides = [1, 1]} : vector<8x160xf32> to vector<8x32xf32>
    %25 = arith.mulf %24, %4 : vector<8x32xf32>
    %26 = vector.extract_strided_slice %23 {offsets = [0, 32], sizes = [8, 32], strides = [1, 1]} : vector<8x160xf32> to vector<8x32xf32>
    %27 = arith.mulf %26, %5 : vector<8x32xf32>
    %28 = arith.addf %25, %27 : vector<8x32xf32>
    %29 = vector.extract_strided_slice %23 {offsets = [0, 64], sizes = [8, 32], strides = [1, 1]} : vector<8x160xf32> to vector<8x32xf32>
    %30 = arith.mulf %29, %4 : vector<8x32xf32>
    %31 = vector.extract_strided_slice %23 {offsets = [0, 96], sizes = [8, 32], strides = [1, 1]} : vector<8x160xf32> to vector<8x32xf32>
    %32 = arith.mulf %31, %5 : vector<8x32xf32>
    %33 = arith.addf %30, %32 : vector<8x32xf32>
    %34 = vector.extract_strided_slice %23 {offsets = [0, 128], sizes = [8, 32], strides = [1, 1]} : vector<8x160xf32> to vector<8x32xf32>
    %c0_20 = arith.constant 0 : index
    %c0_21 = arith.constant 0 : index
    %35 = vector.load %arg4[%c0_20, %c0_21] : memref<8x8xf32, #tpu.memory_space<vmem>>, vector<8x8xf32>
    %36 = arith.truncf %28 : vector<8x32xf32> to vector<8x32xbf16>
    %37 = vector.extract_strided_slice %36 {offsets = [0, 0], sizes = [8, 8], strides = [1, 1]} : vector<8x32xbf16> to vector<8x8xbf16>
    %38 = vector.extract_strided_slice %36 {offsets = [0, 8], sizes = [8, 8], strides = [1, 1]} : vector<8x32xbf16> to vector<8x8xbf16>
    %39 = vector.extract_strided_slice %36 {offsets = [0, 16], sizes = [8, 8], strides = [1, 1]} : vector<8x32xbf16> to vector<8x8xbf16>
    %40 = vector.extract_strided_slice %36 {offsets = [0, 24], sizes = [8, 8], strides = [1, 1]} : vector<8x32xbf16> to vector<8x8xbf16>
    %41 = vector.shape_cast %37 : vector<8x8xbf16> to vector<1x8x8xbf16>
    %42 = vector.shape_cast %38 : vector<8x8xbf16> to vector<1x8x8xbf16>
    %43 = vector.shape_cast %39 : vector<8x8xbf16> to vector<1x8x8xbf16>
    %44 = vector.shape_cast %40 : vector<8x8xbf16> to vector<1x8x8xbf16>
    %45 = tpu.concatenate %41, %42, %43, %44 in 0 : vector<1x8x8xbf16>, vector<1x8x8xbf16>, vector<1x8x8xbf16>, vector<1x8x8xbf16> -> vector<4x8x8xbf16>
    %46 = arith.truncf %33 : vector<8x32xf32> to vector<8x32xbf16>
    %47 = vector.extract_strided_slice %46 {offsets = [0, 0], sizes = [8, 8], strides = [1, 1]} : vector<8x32xbf16> to vector<8x8xbf16>
    %48 = vector.extract_strided_slice %46 {offsets = [0, 8], sizes = [8, 8], strides = [1, 1]} : vector<8x32xbf16> to vector<8x8xbf16>
    %49 = vector.extract_strided_slice %46 {offsets = [0, 16], sizes = [8, 8], strides = [1, 1]} : vector<8x32xbf16> to vector<8x8xbf16>
    %50 = vector.extract_strided_slice %46 {offsets = [0, 24], sizes = [8, 8], strides = [1, 1]} : vector<8x32xbf16> to vector<8x8xbf16>
    %51 = vector.shape_cast %47 : vector<8x8xbf16> to vector<1x8x8xbf16>
    %52 = vector.shape_cast %48 : vector<8x8xbf16> to vector<1x8x8xbf16>
    %53 = vector.shape_cast %49 : vector<8x8xbf16> to vector<1x8x8xbf16>
    %54 = vector.shape_cast %50 : vector<8x8xbf16> to vector<1x8x8xbf16>
    %55 = tpu.concatenate %51, %52, %53, %54 in 0 : vector<1x8x8xbf16>, vector<1x8x8xbf16>, vector<1x8x8xbf16>, vector<1x8x8xbf16> -> vector<4x8x8xbf16>
    %56 = arith.truncf %34 : vector<8x32xf32> to vector<8x32xbf16>
    %57 = vector.extract_strided_slice %56 {offsets = [0, 0], sizes = [8, 8], strides = [1, 1]} : vector<8x32xbf16> to vector<8x8xbf16>
    %58 = vector.extract_strided_slice %56 {offsets = [0, 8], sizes = [8, 8], strides = [1, 1]} : vector<8x32xbf16> to vector<8x8xbf16>
    %59 = vector.extract_strided_slice %56 {offsets = [0, 16], sizes = [8, 8], strides = [1, 1]} : vector<8x32xbf16> to vector<8x8xbf16>
    %60 = vector.extract_strided_slice %56 {offsets = [0, 24], sizes = [8, 8], strides = [1, 1]} : vector<8x32xbf16> to vector<8x8xbf16>
    %61 = vector.shape_cast %57 : vector<8x8xbf16> to vector<1x8x8xbf16>
    %62 = vector.shape_cast %58 : vector<8x8xbf16> to vector<1x8x8xbf16>
    %63 = vector.shape_cast %59 : vector<8x8xbf16> to vector<1x8x8xbf16>
    %64 = vector.shape_cast %60 : vector<8x8xbf16> to vector<1x8x8xbf16>
    %65 = tpu.concatenate %61, %62, %63, %64 in 0 : vector<1x8x8xbf16>, vector<1x8x8xbf16>, vector<1x8x8xbf16>, vector<1x8x8xbf16> -> vector<4x8x8xbf16>
    "tpu.trace_start"() <{level = 10 : i32, message = "hqd,hkd->hqk"}> : () -> ()
    %cst_22 = arith.constant dense<0.000000e+00> : vector<4x8x8xf32>
    %66 = tpu.matmul %45, %55, %cst_22 {dimension_numbers = #tpu.dot_dimension_numbers<[2], [2], [1], [1], [0, 0, 0, 1, 1, 1], [0], [0]>} : vector<4x8x8xbf16>, vector<4x8x8xbf16>, vector<4x8x8xf32> -> vector<4x8x8xf32>
    "tpu.trace_stop"() : () -> ()
    %67 = vector.shape_cast %35 : vector<8x8xf32> to vector<1x8x8xf32>
    %68 = vector.broadcast %67 : vector<1x8x8xf32> to vector<4x8x8xf32>
    %69 = arith.addf %66, %68 : vector<4x8x8xf32>
    %cst_23 = arith.constant dense<0xFF800000> : vector<4x8xf32>
    %70 = vector.multi_reduction <maximumf>, %69, %cst_23 [2] : vector<4x8x8xf32> to vector<4x8xf32>
    %71 = vector.shape_cast %70 : vector<4x8xf32> to vector<4x8x1xf32>
    %72 = vector.broadcast %71 : vector<4x8x1xf32> to vector<4x8x8xf32>
    %73 = arith.subf %69, %72 : vector<4x8x8xf32>
    %74 = math.exp %73 : vector<4x8x8xf32>
    %cst_24 = arith.constant dense<0.000000e+00> : vector<4x8xf32>
    %75 = vector.multi_reduction <add>, %74, %cst_24 [2] : vector<4x8x8xf32> to vector<4x8xf32>
    %76 = vector.shape_cast %75 : vector<4x8xf32> to vector<4x8x1xf32>
    %77 = arith.truncf %74 : vector<4x8x8xf32> to vector<4x8x8xbf16>
    "tpu.trace_start"() <{level = 10 : i32, message = "hqk,hkd->hqd"}> : () -> ()
    %cst_25 = arith.constant dense<0.000000e+00> : vector<4x8x8xf32>
    %78 = tpu.matmul %77, %65, %cst_25 {dimension_numbers = #tpu.dot_dimension_numbers<[2], [1], [1], [2], [0, 0, 0, 1, 1, 2], [0], [0]>} : vector<4x8x8xbf16>, vector<4x8x8xbf16>, vector<4x8x8xf32> -> vector<4x8x8xf32>
    "tpu.trace_stop"() : () -> ()
    %79 = tpu.reciprocal %76 {approx = true} : vector<4x8x1xf32> -> vector<4x8x1xf32>
    %80 = vector.broadcast %79 : vector<4x8x1xf32> to vector<4x8x8xf32>
    %81 = arith.mulf %78, %80 : vector<4x8x8xf32>
    %82 = vector.extract_strided_slice %81 {offsets = [0, 0, 0], sizes = [1, 8, 8], strides = [1, 1, 1]} : vector<4x8x8xf32> to vector<1x8x8xf32>
    %83 = vector.shape_cast %82 : vector<1x8x8xf32> to vector<8x8xf32>
    %84 = vector.extract_strided_slice %81 {offsets = [1, 0, 0], sizes = [1, 8, 8], strides = [1, 1, 1]} : vector<4x8x8xf32> to vector<1x8x8xf32>
    %85 = vector.shape_cast %84 : vector<1x8x8xf32> to vector<8x8xf32>
    %86 = vector.extract_strided_slice %81 {offsets = [2, 0, 0], sizes = [1, 8, 8], strides = [1, 1, 1]} : vector<4x8x8xf32> to vector<1x8x8xf32>
    %87 = vector.shape_cast %86 : vector<1x8x8xf32> to vector<8x8xf32>
    %88 = vector.extract_strided_slice %81 {offsets = [3, 0, 0], sizes = [1, 8, 8], strides = [1, 1, 1]} : vector<4x8x8xf32> to vector<1x8x8xf32>
    %89 = vector.shape_cast %88 : vector<1x8x8xf32> to vector<8x8xf32>
    %90 = tpu.concatenate %83, %85, %87, %89 in 1 : vector<8x8xf32>, vector<8x8xf32>, vector<8x8xf32>, vector<8x8xf32> -> vector<8x32xf32>
    %91 = arith.truncf %90 : vector<8x32xf32> to vector<8x32xbf16>
    %c0_26 = arith.constant 0 : index
    %c0_27 = arith.constant 0 : index
    %92 = vector.load %arg6[%c0_26, %c0_27] : memref<32x32xbf16, #tpu.memory_space<vmem>>, vector<32x32xbf16>
    %cst_28 = arith.constant dense<0.000000e+00> : vector<8x32xf32>
    %93 = tpu.matmul %91, %92, %cst_28 {dimension_numbers = #tpu.dot_dimension_numbers<[1], [0], [0], [1], [0, 0, 1, 1], [], []>} : vector<8x32xbf16>, vector<32x32xbf16>, vector<8x32xf32> -> vector<8x32xf32>
    %94 = arith.addf %1, %93 : vector<8x32xf32>
    %c1 = arith.constant 1 : index
    %c0_29 = arith.constant 0 : index
    %95 = vector.load %arg3[%c1, %c0_29] : memref<3x32xf32, #tpu.memory_space<vmem>>, vector<1x32xf32>
    %96 = arith.mulf %94, %94 : vector<8x32xf32>
    %cst_30 = arith.constant dense<0.000000e+00> : vector<8xf32>
    %97 = vector.multi_reduction <add>, %96, %cst_30 [1] : vector<8x32xf32> to vector<8xf32>
    %98 = vector.shape_cast %97 : vector<8xf32> to vector<8x1xf32>
    %cst_31 = arith.constant 3.200000e+01 : f32
    %99 = vector.broadcast %cst_31 : f32 to vector<8x1xf32>
    %100 = arith.divf %98, %99 : vector<8x1xf32>
    %cst_32 = arith.constant 9.99999974E-6 : f32
    %101 = vector.broadcast %cst_32 : f32 to vector<8x1xf32>
    %102 = arith.addf %100, %101 : vector<8x1xf32>
    %103 = math.rsqrt %102 : vector<8x1xf32>
    %104 = vector.broadcast %103 : vector<8x1xf32> to vector<8x32xf32>
    %105 = arith.mulf %94, %104 : vector<8x32xf32>
    %106 = vector.broadcast %95 : vector<1x32xf32> to vector<8x32xf32>
    %107 = arith.mulf %105, %106 : vector<8x32xf32>
    %108 = arith.truncf %107 : vector<8x32xf32> to vector<8x32xbf16>
    %c0_33 = arith.constant 0 : index
    %c0_34 = arith.constant 0 : index
    %109 = vector.load %arg7[%c0_33, %c0_34] : memref<32x64xbf16, #tpu.memory_space<vmem>>, vector<32x64xbf16>
    %cst_35 = arith.constant dense<0.000000e+00> : vector<8x64xf32>
    %110 = tpu.matmul %108, %109, %cst_35 {dimension_numbers = #tpu.dot_dimension_numbers<[1], [0], [0], [1], [0, 0, 1, 1], [], []>} : vector<8x32xbf16>, vector<32x64xbf16>, vector<8x64xf32> -> vector<8x64xf32>
    %c0_36 = arith.constant 0 : index
    %c0_37 = arith.constant 0 : index
    %111 = vector.load %arg8[%c0_36, %c0_37] : memref<32x96xbf16, #tpu.memory_space<vmem>>, vector<32x96xbf16>
    %cst_38 = arith.constant dense<0.000000e+00> : vector<16x96xf32>
    %112 = tpu.matmul %3, %111, %cst_38 {dimension_numbers = #tpu.dot_dimension_numbers<[1], [0], [0], [1], [0, 0, 1, 1], [], []>} : vector<16x32xbf16>, vector<32x96xbf16>, vector<16x96xf32> -> vector<16x96xf32>
    %113 = vector.extract_strided_slice %110 {offsets = [0, 0], sizes = [8, 32], strides = [1, 1]} : vector<8x64xf32> to vector<8x32xf32>
    %114 = arith.mulf %113, %4 : vector<8x32xf32>
    %115 = vector.extract_strided_slice %110 {offsets = [0, 32], sizes = [8, 32], strides = [1, 1]} : vector<8x64xf32> to vector<8x32xf32>
    %116 = arith.mulf %115, %5 : vector<8x32xf32>
    %117 = arith.addf %114, %116 : vector<8x32xf32>
    %118 = vector.extract_strided_slice %112 {offsets = [0, 0], sizes = [16, 32], strides = [1, 1]} : vector<16x96xf32> to vector<16x32xf32>
    %119 = arith.mulf %118, %6 : vector<16x32xf32>
    %120 = vector.extract_strided_slice %112 {offsets = [0, 32], sizes = [16, 32], strides = [1, 1]} : vector<16x96xf32> to vector<16x32xf32>
    %121 = arith.mulf %120, %7 : vector<16x32xf32>
    %122 = arith.addf %119, %121 : vector<16x32xf32>
    %123 = vector.extract_strided_slice %112 {offsets = [0, 64], sizes = [16, 32], strides = [1, 1]} : vector<16x96xf32> to vector<16x32xf32>
    %124 = arith.truncf %117 : vector<8x32xf32> to vector<8x32xbf16>
    %125 = vector.extract_strided_slice %124 {offsets = [0, 0], sizes = [8, 8], strides = [1, 1]} : vector<8x32xbf16> to vector<8x8xbf16>
    %126 = vector.extract_strided_slice %124 {offsets = [0, 8], sizes = [8, 8], strides = [1, 1]} : vector<8x32xbf16> to vector<8x8xbf16>
    %127 = vector.extract_strided_slice %124 {offsets = [0, 16], sizes = [8, 8], strides = [1, 1]} : vector<8x32xbf16> to vector<8x8xbf16>
    %128 = vector.extract_strided_slice %124 {offsets = [0, 24], sizes = [8, 8], strides = [1, 1]} : vector<8x32xbf16> to vector<8x8xbf16>
    %129 = vector.shape_cast %125 : vector<8x8xbf16> to vector<1x8x8xbf16>
    %130 = vector.shape_cast %126 : vector<8x8xbf16> to vector<1x8x8xbf16>
    %131 = vector.shape_cast %127 : vector<8x8xbf16> to vector<1x8x8xbf16>
    %132 = vector.shape_cast %128 : vector<8x8xbf16> to vector<1x8x8xbf16>
    %133 = tpu.concatenate %129, %130, %131, %132 in 0 : vector<1x8x8xbf16>, vector<1x8x8xbf16>, vector<1x8x8xbf16>, vector<1x8x8xbf16> -> vector<4x8x8xbf16>
    %134 = arith.truncf %122 : vector<16x32xf32> to vector<16x32xbf16>
    %135 = vector.extract_strided_slice %134 {offsets = [0, 0], sizes = [16, 8], strides = [1, 1]} : vector<16x32xbf16> to vector<16x8xbf16>
    %136 = vector.extract_strided_slice %134 {offsets = [0, 8], sizes = [16, 8], strides = [1, 1]} : vector<16x32xbf16> to vector<16x8xbf16>
    %137 = vector.extract_strided_slice %134 {offsets = [0, 16], sizes = [16, 8], strides = [1, 1]} : vector<16x32xbf16> to vector<16x8xbf16>
    %138 = vector.extract_strided_slice %134 {offsets = [0, 24], sizes = [16, 8], strides = [1, 1]} : vector<16x32xbf16> to vector<16x8xbf16>
    %139 = vector.shape_cast %135 : vector<16x8xbf16> to vector<1x16x8xbf16>
    %140 = vector.shape_cast %136 : vector<16x8xbf16> to vector<1x16x8xbf16>
    %141 = vector.shape_cast %137 : vector<16x8xbf16> to vector<1x16x8xbf16>
    %142 = vector.shape_cast %138 : vector<16x8xbf16> to vector<1x16x8xbf16>
    %143 = tpu.concatenate %139, %140, %141, %142 in 0 : vector<1x16x8xbf16>, vector<1x16x8xbf16>, vector<1x16x8xbf16>, vector<1x16x8xbf16> -> vector<4x16x8xbf16>
    %144 = arith.truncf %123 : vector<16x32xf32> to vector<16x32xbf16>
    %145 = vector.extract_strided_slice %144 {offsets = [0, 0], sizes = [16, 8], strides = [1, 1]} : vector<16x32xbf16> to vector<16x8xbf16>
    %146 = vector.extract_strided_slice %144 {offsets = [0, 8], sizes = [16, 8], strides = [1, 1]} : vector<16x32xbf16> to vector<16x8xbf16>
    %147 = vector.extract_strided_slice %144 {offsets = [0, 16], sizes = [16, 8], strides = [1, 1]} : vector<16x32xbf16> to vector<16x8xbf16>
    %148 = vector.extract_strided_slice %144 {offsets = [0, 24], sizes = [16, 8], strides = [1, 1]} : vector<16x32xbf16> to vector<16x8xbf16>
    %149 = vector.shape_cast %145 : vector<16x8xbf16> to vector<1x16x8xbf16>
    %150 = vector.shape_cast %146 : vector<16x8xbf16> to vector<1x16x8xbf16>
    %151 = vector.shape_cast %147 : vector<16x8xbf16> to vector<1x16x8xbf16>
    %152 = vector.shape_cast %148 : vector<16x8xbf16> to vector<1x16x8xbf16>
    %153 = tpu.concatenate %149, %150, %151, %152 in 0 : vector<1x16x8xbf16>, vector<1x16x8xbf16>, vector<1x16x8xbf16>, vector<1x16x8xbf16> -> vector<4x16x8xbf16>
    "tpu.trace_start"() <{level = 10 : i32, message = "hqd,hkd->hqk"}> : () -> ()
    %cst_39 = arith.constant dense<0.000000e+00> : vector<4x8x16xf32>
    %154 = tpu.matmul %133, %143, %cst_39 {dimension_numbers = #tpu.dot_dimension_numbers<[2], [2], [1], [1], [0, 0, 0, 1, 1, 1], [0], [0]>} : vector<4x8x8xbf16>, vector<4x16x8xbf16>, vector<4x8x16xf32> -> vector<4x8x16xf32>
    "tpu.trace_stop"() : () -> ()
    %cst_40 = arith.constant dense<0xFF800000> : vector<4x8xf32>
    %155 = vector.multi_reduction <maximumf>, %154, %cst_40 [2] : vector<4x8x16xf32> to vector<4x8xf32>
    %156 = vector.shape_cast %155 : vector<4x8xf32> to vector<4x8x1xf32>
    %157 = vector.broadcast %156 : vector<4x8x1xf32> to vector<4x8x16xf32>
    %158 = arith.subf %154, %157 : vector<4x8x16xf32>
    %159 = math.exp %158 : vector<4x8x16xf32>
    %cst_41 = arith.constant dense<0.000000e+00> : vector<4x8xf32>
    %160 = vector.multi_reduction <add>, %159, %cst_41 [2] : vector<4x8x16xf32> to vector<4x8xf32>
    %161 = vector.shape_cast %160 : vector<4x8xf32> to vector<4x8x1xf32>
    %162 = arith.truncf %159 : vector<4x8x16xf32> to vector<4x8x16xbf16>
    "tpu.trace_start"() <{level = 10 : i32, message = "hqk,hkd->hqd"}> : () -> ()
    %cst_42 = arith.constant dense<0.000000e+00> : vector<4x8x8xf32>
    %163 = tpu.matmul %162, %153, %cst_42 {dimension_numbers = #tpu.dot_dimension_numbers<[2], [1], [1], [2], [0, 0, 0, 1, 1, 2], [0], [0]>} : vector<4x8x16xbf16>, vector<4x16x8xbf16>, vector<4x8x8xf32> -> vector<4x8x8xf32>
    "tpu.trace_stop"() : () -> ()
    %164 = tpu.reciprocal %161 {approx = true} : vector<4x8x1xf32> -> vector<4x8x1xf32>
    %165 = vector.broadcast %164 : vector<4x8x1xf32> to vector<4x8x8xf32>
    %166 = arith.mulf %163, %165 : vector<4x8x8xf32>
    %167 = vector.extract_strided_slice %166 {offsets = [0, 0, 0], sizes = [1, 8, 8], strides = [1, 1, 1]} : vector<4x8x8xf32> to vector<1x8x8xf32>
    %168 = vector.shape_cast %167 : vector<1x8x8xf32> to vector<8x8xf32>
    %169 = vector.extract_strided_slice %166 {offsets = [1, 0, 0], sizes = [1, 8, 8], strides = [1, 1, 1]} : vector<4x8x8xf32> to vector<1x8x8xf32>
    %170 = vector.shape_cast %169 : vector<1x8x8xf32> to vector<8x8xf32>
    %171 = vector.extract_strided_slice %166 {offsets = [2, 0, 0], sizes = [1, 8, 8], strides = [1, 1, 1]} : vector<4x8x8xf32> to vector<1x8x8xf32>
    %172 = vector.shape_cast %171 : vector<1x8x8xf32> to vector<8x8xf32>
    %173 = vector.extract_strided_slice %166 {offsets = [3, 0, 0], sizes = [1, 8, 8], strides = [1, 1, 1]} : vector<4x8x8xf32> to vector<1x8x8xf32>
    %174 = vector.shape_cast %173 : vector<1x8x8xf32> to vector<8x8xf32>
    %175 = tpu.concatenate %168, %170, %172, %174 in 1 : vector<8x8xf32>, vector<8x8xf32>, vector<8x8xf32>, vector<8x8xf32> -> vector<8x32xf32>
    %176 = arith.truncf %175 : vector<8x32xf32> to vector<8x32xbf16>
    %c0_43 = arith.constant 0 : index
    %c0_44 = arith.constant 0 : index
    %177 = vector.load %arg9[%c0_43, %c0_44] : memref<32x32xbf16, #tpu.memory_space<vmem>>, vector<32x32xbf16>
    %cst_45 = arith.constant dense<0.000000e+00> : vector<8x32xf32>
    %178 = tpu.matmul %176, %177, %cst_45 {dimension_numbers = #tpu.dot_dimension_numbers<[1], [0], [0], [1], [0, 0, 1, 1], [], []>} : vector<8x32xbf16>, vector<32x32xbf16>, vector<8x32xf32> -> vector<8x32xf32>
    %179 = arith.addf %94, %178 : vector<8x32xf32>
    %c2 = arith.constant 2 : index
    %c0_46 = arith.constant 0 : index
    %180 = vector.load %arg3[%c2, %c0_46] : memref<3x32xf32, #tpu.memory_space<vmem>>, vector<1x32xf32>
    %181 = arith.mulf %179, %179 : vector<8x32xf32>
    %cst_47 = arith.constant dense<0.000000e+00> : vector<8xf32>
    %182 = vector.multi_reduction <add>, %181, %cst_47 [1] : vector<8x32xf32> to vector<8xf32>
    %183 = vector.shape_cast %182 : vector<8xf32> to vector<8x1xf32>
    %cst_48 = arith.constant 3.200000e+01 : f32
    %184 = vector.broadcast %cst_48 : f32 to vector<8x1xf32>
    %185 = arith.divf %183, %184 : vector<8x1xf32>
    %cst_49 = arith.constant 9.99999974E-6 : f32
    %186 = vector.broadcast %cst_49 : f32 to vector<8x1xf32>
    %187 = arith.addf %185, %186 : vector<8x1xf32>
    %188 = math.rsqrt %187 : vector<8x1xf32>
    %189 = vector.broadcast %188 : vector<8x1xf32> to vector<8x32xf32>
    %190 = arith.mulf %179, %189 : vector<8x32xf32>
    %191 = vector.broadcast %180 : vector<1x32xf32> to vector<8x32xf32>
    %192 = arith.mulf %190, %191 : vector<8x32xf32>
    %193 = arith.truncf %192 : vector<8x32xf32> to vector<8x32xbf16>
    %c0_50 = arith.constant 0 : index
    %c0_51 = arith.constant 0 : index
    %194 = vector.load %arg10[%c0_50, %c0_51] : memref<32x128xbf16, #tpu.memory_space<vmem>>, vector<32x128xbf16>
    %cst_52 = arith.constant dense<0.000000e+00> : vector<8x128xf32>
    %195 = tpu.matmul %193, %194, %cst_52 {dimension_numbers = #tpu.dot_dimension_numbers<[1], [0], [0], [1], [0, 0, 1, 1], [], []>} : vector<8x32xbf16>, vector<32x128xbf16>, vector<8x128xf32> -> vector<8x128xf32>
    %196 = vector.extract_strided_slice %195 {offsets = [0, 0], sizes = [8, 64], strides = [1, 1]} : vector<8x128xf32> to vector<8x64xf32>
    %197 = vector.extract_strided_slice %195 {offsets = [0, 64], sizes = [8, 64], strides = [1, 1]} : vector<8x128xf32> to vector<8x64xf32>
    %198 = arith.negf %196 : vector<8x64xf32>
    %199 = math.exp %198 : vector<8x64xf32>
    %cst_53 = arith.constant 1.000000e+00 : f32
    %200 = vector.broadcast %cst_53 : f32 to vector<8x64xf32>
    %201 = arith.addf %200, %199 : vector<8x64xf32>
    %202 = arith.divf %200, %201 : vector<8x64xf32>
    %203 = arith.mulf %196, %202 : vector<8x64xf32>
    %204 = arith.mulf %203, %197 : vector<8x64xf32>
    %205 = arith.truncf %204 : vector<8x64xf32> to vector<8x64xbf16>
    %c0_54 = arith.constant 0 : index
    %c0_55 = arith.constant 0 : index
    %206 = vector.load %arg11[%c0_54, %c0_55] : memref<64x32xbf16, #tpu.memory_space<vmem>>, vector<64x32xbf16>
    %cst_56 = arith.constant dense<0.000000e+00> : vector<8x32xf32>
    %207 = tpu.matmul %205, %206, %cst_56 {dimension_numbers = #tpu.dot_dimension_numbers<[1], [0], [0], [1], [0, 0, 1, 1], [], []>} : vector<8x64xbf16>, vector<64x32xbf16>, vector<8x32xf32> -> vector<8x32xf32>
    %208 = arith.addf %179, %207 : vector<8x32xf32>
    %c0_57 = arith.constant 0 : index
    %c0_58 = arith.constant 0 : index
    %c0_59 = arith.constant 0 : index
    %209 = vector.load %arg16[%c0_57, %c0_58, %c0_59] : memref<1x8x32xf32, #tpu.memory_space<vmem>>, vector<1x8x32xf32>
    %210 = vector.shape_cast %209 : vector<1x8x32xf32> to vector<8x32xf32>
    %211 = vector.shape_cast %208 : vector<8x32xf32> to vector<1x8x32xf32>
    tpu.vector_store %arg16[%c0_57, %c0_58, %c0_59], %211 {strides = array<i32>} : memref<1x8x32xf32, #tpu.memory_space<vmem>>, vector<1x8x32xf32>,
    return
  }
  func.func @transform_0(%arg0: i32) -> (i32, i32, i32) {
    %c0_i32 = arith.constant 0 : i32
    %c0_i32_0 = arith.constant 0 : i32
    %c0_i32_1 = arith.constant 0 : i32
    return %arg0, %c0_i32, %c0_i32_0 : i32, i32, i32
  }
  func.func @transform_1(%arg0: i32) -> (i32, i32, i32) {
    %c0_i32 = arith.constant 0 : i32
    %c0_i32_0 = arith.constant 0 : i32
    %c0_i32_1 = arith.constant 0 : i32
    return %arg0, %c0_i32, %c0_i32_0 : i32, i32, i32
  }
  func.func @transform_2(%arg0: i32) -> (i32, i32) {
    %c0_i32 = arith.constant 0 : i32
    %c0_i32_0 = arith.constant 0 : i32
    %c0_i32_1 = arith.constant 0 : i32
    return %c0_i32, %c0_i32_0 : i32, i32
  }
  func.func @transform_3(%arg0: i32) -> (i32, i32) {
    %c0_i32 = arith.constant 0 : i32
    %c0_i32_0 = arith.constant 0 : i32
    %c0_i32_1 = arith.constant 0 : i32
    return %c0_i32, %c0_i32_0 : i32, i32
  }
  func.func @transform_4(%arg0: i32) -> (i32, i32) {
    %c0_i32 = arith.constant 0 : i32
    %c0_i32_0 = arith.constant 0 : i32
    %c0_i32_1 = arith.constant 0 : i32
    return %c0_i32, %c0_i32_0 : i32, i32
  }
  func.func @transform_5(%arg0: i32) -> (i32, i32) {
    %c0_i32 = arith.constant 0 : i32
    %c0_i32_0 = arith.constant 0 : i32
    %c0_i32_1 = arith.constant 0 : i32
    return %c0_i32, %c0_i32_0 : i32, i32
  }
  func.func @transform_6(%arg0: i32) -> (i32, i32) {
    %c0_i32 = arith.constant 0 : i32
    %c0_i32_0 = arith.constant 0 : i32
    %c0_i32_1 = arith.constant 0 : i32
    return %c0_i32, %c0_i32_0 : i32, i32
  }
  func.func @transform_7(%arg0: i32) -> (i32, i32) {
    %c0_i32 = arith.constant 0 : i32
    %c0_i32_0 = arith.constant 0 : i32
    %c0_i32_1 = arith.constant 0 : i32
    return %c0_i32, %c0_i32_0 : i32, i32
  }
  func.func @transform_8(%arg0: i32) -> (i32, i32) {
    %c0_i32 = arith.constant 0 : i32
    %c0_i32_0 = arith.constant 0 : i32
    %c0_i32_1 = arith.constant 0 : i32
    return %c0_i32, %c0_i32_0 : i32, i32
  }
  func.func @transform_9(%arg0: i32) -> (i32, i32) {
    %c0_i32 = arith.constant 0 : i32
    %c0_i32_0 = arith.constant 0 : i32
    %c0_i32_1 = arith.constant 0 : i32
    return %c0_i32, %c0_i32_0 : i32, i32
  }
  func.func @transform_10(%arg0: i32) -> (i32, i32) {
    %c0_i32 = arith.constant 0 : i32
    %c0_i32_0 = arith.constant 0 : i32
    %c0_i32_1 = arith.constant 0 : i32
    return %c0_i32, %c0_i32_0 : i32, i32
  }
  func.func @transform_11(%arg0: i32) -> (i32, i32) {
    %c0_i32 = arith.constant 0 : i32
    %c0_i32_0 = arith.constant 0 : i32
    %c0_i32_1 = arith.constant 0 : i32
    return %c0_i32, %c0_i32_0 : i32, i32
  }
  func.func @transform_12(%arg0: i32) -> (i32, i32) {
    %c0_i32 = arith.constant 0 : i32
    %c0_i32_0 = arith.constant 0 : i32
    %c0_i32_1 = arith.constant 0 : i32
    return %c0_i32, %c0_i32_0 : i32, i32
  }
  func.func @transform_13(%arg0: i32) -> (i32, i32) {
    %c0_i32 = arith.constant 0 : i32
    %c0_i32_0 = arith.constant 0 : i32
    %c0_i32_1 = arith.constant 0 : i32
    return %c0_i32, %c0_i32_0 : i32, i32
  }
  func.func @transform_14(%arg0: i32) -> (i32, i32) {
    %c0_i32 = arith.constant 0 : i32
    %c0_i32_0 = arith.constant 0 : i32
    %c0_i32_1 = arith.constant 0 : i32
    return %c0_i32, %c0_i32_0 : i32, i32
  }
  func.func @transform_15(%arg0: i32) -> (i32, i32, i32) {
    %c0_i32 = arith.constant 0 : i32
    %c0_i32_0 = arith.constant 0 : i32
    %c0_i32_1 = arith.constant 0 : i32
    return %arg0, %c0_i32, %c0_i32_0 : i32, i32, i32
  }
}

</mosaic_0001>

<bundles_post_ra>
// kernel: tpu_custom_call.1
= control target key start
LH: loop header
LB: loop body
LE: loop exit
PB: predicated region body
PF: predicated region fallthrough
CT: control target
= control target key end

     0   :  { %s3884_s0 = inlined_call_operand.vmem [shape: f32[2,8,32], index: 0, kind: input, shape index: {}]   ;;  %s3885_s1 = inlined_call_operand.hbm [shape: bf16[2,16,32], index: 1, kind: input, shape index: {}]   ;;  %s3886_s2 = inlined_call_operand.hbm [shape: f32[3,32], index: 2, kind: input, shape index: {}]   ;;  %s3887_s3 = inlined_call_operand.hbm [shape: f32[8,8], index: 3, kind: input, shape index: {}]   ;;  %s3888_s4 = inlined_call_operand.vmem [shape: bf16[32,160], index: 4, kind: input, shape index: {}]   ;;  %s3889_s5 = inlined_call_operand.hbm [shape: bf16[32,32], index: 5, kind: input, shape index: {}]   ;;  %s3890_s6 = inlined_call_operand.hbm [shape: bf16[32,64], index: 6, kind: input, shape index: {}]   ;;  %s3891_s7 = inlined_call_operand.hbm [shape: bf16[32,96], index: 7, kind: input, shape index: {}]   ;;  %s3892_s8 = inlined_call_operand.hbm [shape: bf16[32,32], index: 8, kind: input, shape index: {}]   ;;  %s3893_s9 = inlined_call_operand.vmem [shape: bf16[32,128], index: 9, kind: input, shape index: {}]   ;;  %s3894_s10 = inlined_call_operand.vmem [shape: bf16[64,32], index: 10, kind: input, shape index: {}]   ;;  %s3895_s11 = inlined_call_operand.hbm [shape: f32[8,32], index: 11, kind: input, shape index: {}]   ;;  %s3896_s12 = inlined_call_operand.hbm [shape: f32[8,32], index: 12, kind: input, shape index: {}]   ;;  %s3897_s13 = inlined_call_operand.hbm [shape: f32[16,32], index: 13, kind: input, shape index: {}]   ;;  %s3898_s14 = inlined_call_operand.hbm [shape: f32[16,32], index: 14, kind: input, shape index: {}]   ;;  %s3899_s15 = inlined_call_operand.hbm [shape: f32[2,8,32], index: 15, kind: output, shape index: {}]  }
   0x1   :  { %3911 = sst [smem:[#allocation28_spill]] %s3886_s2 }
   0x2   :  { %3912 = sst [smem:[#allocation29_spill]] %s3887_s3 }
   0x3   :  { %3913 = sst [smem:[#allocation30_spill]] %s3889_s5 }
   0x4   :  { %3914 = sst [smem:[#allocation31_spill]] %s3890_s6 }
   0x5   :  { %3915 = sst [smem:[#allocation32_spill]] %s3891_s7 }
   0x6   :  { %3916 = sst [smem:[#allocation33_spill]] %s3892_s8 }
   0x7   :  { %3917 = sst [smem:[#allocation34_spill]] %s3895_s11 }
   0x8   :  { %3918 = sst [smem:[#allocation35_spill]] %s3896_s12 }
   0x9   :  { %3919 = sst [smem:[#allocation36_spill]] %s3897_s13 }
   0xa   :  { %3920 = sst [smem:[#allocation37_spill]] %s3898_s14 }
   0xb   :  { %3921 = sst [smem:[#allocation38_spill]] %s3899_s15 }
   0xc   :  { %20 = vsyncpa [#allocation3], 0 }
   0xd   :  { %22 = vsyncpa [#allocation3 + $0x1], 0 }
   0xe   :  { %23 = vsyncpa [#allocation6], 0 }
   0xf   :  { %24 = vsyncpa [#allocation9], 0 }
  0x10   :  { %25 = vsyncpa [#allocation12], 0 }
  0x11   :  { %26 = vsyncpa [#allocation15], 0 }
  0x12   :  { %27 = vsyncpa [#allocation18], 0 }
  0x13   :  { %28 = vsyncpa [#allocation4], 0 }
  0x14   :  { %30 = vsyncpa [#allocation4 + $0x1], 0  ;;  %s3345_s18 = smov 0   ;;  %s3347_s19 = smov 0  }
  0x15   :  { %s3349_s20 = smov 0   ;;  %s3351_s21 = smov 0  }
  0x16 LB: > { %s3237_s22 = smov [#allocation5]   ;;  %s3366_s24 = sadd.s32 4294967295, %s3235_s21   ;;  %s3235_s21 = sphi %s3351_s21, %s3964_s21   ;;  %s3231_s20 = sphi %s3349_s20, %s3963_s20   ;;  %s3227_s19 = sphi %s3347_s19, %s3962_s19   ;;  %s3223_s18 = sphi %s3345_s18, %s3961_s18  }
  0x17   : > { %s405_s23 = sshll.u32 %s3237_s22, 4  ;;  %p2357_p0 = scmp.ge.s32.totalorder %s3235_s21, 1  ;;  %s406_s23 = int_to_ptr.vmem [resolvable:$true] %s405_s23 }
  0x18   : > { %p3901_p1 = scmp.eq.s32.totalorder %s3366_s24, 0  ;;  %p392_p2 = scmp.lt.s32.totalorder %s3235_s21, 3 }
  0x19   : > { %s3238_s26 = smov [#allocation8]   ;;  %s3239_s29 = smov [#allocation11]  }
  0x1a   : > { %p3371_p3 = pnand %p2357_p0, %p392_p2  ;;  %s429_s27 = sshll.u32 %s3238_s26, 4  ;;  %s3378_s27 = int_to_ptr.vmem [resolvable:$true] %s429_s27 }
  0x1b   : > { %s455_s30 = sshll.u32 %s3239_s29, 4  ;;  %s2874_s17 = scalar_lea.vmem %s406_s23, 64  ;;  %s3386_s30 = int_to_ptr.vmem [resolvable:$true] %s455_s30 }
  0x1c   : > { %s3922_s25 = scalar_select %p3371_p3, 1, 0 }
  0x1d   : > { %p2681_p5 = pneg %p3371_p3  ;;  %p2875_p8 = scmp.ne.s32.totalorder %s406_s23, %s2874_s17 }
  0x1e   : > { %p2882_p11 = scmp.lt.s32.totalorder %s406_s23, %s406_s23  ;;  %p2883_p12 = scmp.lt.s32.totalorder %s2874_s17, %s2874_s17 }
  0x1f   : > { %p3382_p6 = pnand %p2681_p5, %p3901_p1 }
  0x20   : > { %p2884_p13 = por %p2883_p12, %p2882_p11 }
  0x21   : > { %p3390_p7 = pneg %p3382_p6 }
  0x23   : > { %p2877_p9 = pnand %p2875_p8, %p3390_p7 }
  0x25   : > { %p2878_p10 = pneg %p2877_p9 }
  0x27   : > { %p2885_p0 = pnand %p2884_p13, %p2878_p10 }
  0x29   : > { %2888 = shalt.err (!%p2885_p0)
}
  0x2a   : > { %s3925_s2 = sld [smem:[#allocation28_spill]]  ;;  %s2900_s29 = scalar_lea.vmem %s3378_s27, 256 }
  0x2b   : > { %p2901_p2 = scmp.ne.s32.totalorder %s3378_s27, %s2900_s29  ;;  %p2908_p9 = scmp.lt.s32.totalorder %s3378_s27, %s3378_s27 }
  0x2c   : > { %p2909_p11 = scmp.lt.s32.totalorder %s2900_s29, %s2900_s29 }
  0x2d   : > { %p2903_p5 = pnand %p2901_p2, %p3390_p7 }
  0x2e   : > { %p2910_p10 = por %p2909_p11, %p2908_p9 }
  0x2f   : > { %p2904_p8 = pneg %p2903_p5 }
  0x30   : > { %2684 = dma.hbm_to_vmem [thread:$0]  (!%p3382_p6), %s3925_s2, 64, %s406_s23, [#allocation6]  }
  0x31   : > { %p2911_p12 = pnand %p2910_p10, %p2904_p8 }
  0x33   : > { %2914 = shalt.err (!%p2911_p12)
}
  0x34   : > { %s3903_s17 = smov 64   ;;  %s3905_s22 = smov 4  }
  0x35   : > { %s3926_s5 = sld [smem:[#allocation30_spill]]  ;;  %s2926_s29 = scalar_lea.vmem %s3386_s30, 256 }
  0x36   : > { %p2927_p13 = scmp.ne.s32.totalorder %s3386_s30, %s2926_s29  ;;  %p2934_p5 = scmp.lt.s32.totalorder %s3386_s30, %s3386_s30 }
  0x37   : > { %p2935_p8 = scmp.lt.s32.totalorder %s2926_s29, %s2926_s29 }
  0x38   : > { %p2929_p0 = pnand %p2927_p13, %p3390_p7 }
  0x39   : > { %p2936_p9 = por %p2935_p8, %p2934_p5 }
  0x3a   : > { %p2930_p2 = pneg %p2929_p0 }
  0x3b   : > { %2690 = dma.hbm_to_vmem [thread:$0]  (!%p3382_p6), %s3926_s5, 256, %s3378_s27, [#allocation9], %s3903_s17, %s3903_s17, %s3905_s22  }
  0x3c   : > { %p2937_p11 = pnand %p2936_p9, %p2930_p2 }
  0x3e   : > { %2940 = shalt.err (!%p2937_p11)
}
  0x3f   : > { %s3927_s7 = sld [smem:[#allocation32_spill]]  ;;  %s3242_s27 = smov [#allocation14]  }
  0x40   : > { %s488_s26 = sshll.u32 %s3242_s27, 4  ;;  %s3243_s5 = smov [#allocation17]   ;;  %s489_s26 = int_to_ptr.vmem [resolvable:$true] %s488_s26 }
  0x41   : > { %s509_s15 = sshll.u32 %s3243_s5, 4  ;;  %s2952_s29 = scalar_lea.vmem %s489_s26, 128  ;;  %s510_s15 = int_to_ptr.vmem [resolvable:$true] %s509_s15 }
  0x42   : > { %p2953_p10 = scmp.ne.s32.totalorder %s489_s26, %s2952_s29  ;;  %p2960_p0 = scmp.lt.s32.totalorder %s489_s26, %s489_s26 }
  0x43   : > { %p2961_p2 = scmp.lt.s32.totalorder %s2952_s29, %s2952_s29 }
  0x44   : > { %p2955_p12 = pnand %p2953_p10, %p3390_p7 }
  0x45   : > { %2696 = dma.hbm_to_vmem [thread:$0]  (!%p3382_p6), %s3927_s7, 256, %s3386_s30, [#allocation12], %s3903_s17, %s3903_s17, %s3905_s22  }
  0x46   : > { %p2956_p13 = pneg %p2955_p12  ;;  %p2962_p5 = por %p2961_p2, %p2960_p0 }
  0x48   : > { %p2963_p8 = pnand %p2962_p5, %p2956_p13 }
  0x4a   : > { %2966 = shalt.err (!%p2963_p8)
}
  0x4b   : > { %s3928_s11 = sld [smem:[#allocation34_spill]]  ;;  %s2978_s30 = scalar_lea.vmem %s510_s15, 256 }
  0x4c   : > { %p2979_p9 = scmp.ne.s32.totalorder %s510_s15, %s2978_s30  ;;  %p2986_p10 = scmp.lt.s32.totalorder %s510_s15, %s510_s15 }
  0x4d   : > { %p2987_p12 = scmp.lt.s32.totalorder %s2978_s30, %s2978_s30 }
  0x4e   : > { %p2981_p11 = pnand %p2979_p9, %p3390_p7 }
  0x4f   : > { %p2988_p1 = por %p2987_p12, %p2986_p10 }
  0x50   : > { %p2982_p4 = pneg %p2981_p11 }
  0x51   : > { %2702 = dma.hbm_to_vmem [thread:$0]  (!%p3382_p6), %s3928_s11, 128, %s489_s26, [#allocation15]  }
  0x52   : > { %p2989_p3 = pnand %p2988_p1, %p2982_p4 }
  0x54   : > { %2992 = shalt.err (!%p2989_p3)
}
  0x55   : > { %s3907_s5 = smov 128   ;;  %s3908_s27 = smov 8  }
  0x56   : > { %s3929_s13 = sld [smem:[#allocation36_spill]]  ;;  %s3246_s2 = smov [#allocation7]  }
  0x57   : > { %s416_s23 = sshll.u32 %s3246_s2, 4  ;;  %s3247_s17 = smov [#allocation10]   ;;  %s417_s23 = int_to_ptr.vmem [resolvable:$true] %s416_s23 }
  0x58   : > { %s442_s30 = sshll.u32 %s3247_s17, 4  ;;  %s3004_s22 = scalar_lea.vmem %s417_s23, 128  ;;  %s443_s30 = int_to_ptr.vmem [resolvable:$true] %s442_s30 }
  0x59   : > { %p3005_p1 = scmp.ne.s32.totalorder %s417_s23, %s3004_s22  ;;  %p3012_p13 = scmp.lt.s32.totalorder %s417_s23, %s417_s23 }
  0x5a   : > { %p3013_p0 = scmp.lt.s32.totalorder %s3004_s22, %s3004_s22 }
  0x5b   : > { %p3007_p3 = pnand %p3005_p1, %p3390_p7 }
  0x5c   : > { %2708 = dma.hbm_to_vmem [thread:$0]  (!%p3382_p6), %s3929_s13, 256, %s510_s15, [#allocation18], %s3907_s5, %s3907_s5, %s3908_s27  }
  0x5d   : > { %p3008_p4 = pneg %p3007_p3  ;;  %p3014_p2 = por %p3013_p0, %p3012_p13 }
  0x5f   : > { %p3015_p5 = pnand %p3014_p2, %p3008_p4 }
  0x61   : > { %3018 = shalt.err (!%p3015_p5)
}
  0x62   : > { %s3930_s3 = sld [smem:[#allocation29_spill]]  ;;  %s3030_s15 = scalar_lea.vmem %s443_s30, 256 }
  0x63   : > { %p3031_p8 = scmp.ne.s32.totalorder %s443_s30, %s3030_s15  ;;  %p3038_p10 = scmp.lt.s32.totalorder %s443_s30, %s443_s30 }
  0x64   : > { %p3039_p12 = scmp.lt.s32.totalorder %s3030_s15, %s3030_s15 }
  0x65   : > { %p3033_p9 = pnand %p3031_p8, %p3390_p7 }
  0x66   : > { %p3040_p1 = por %p3039_p12, %p3038_p10 }
  0x67   : > { %p3034_p11 = pneg %p3033_p9 }
  0x68   : > { %2687 = dma.hbm_to_vmem [thread:$0]  (!%p3382_p6), %s3930_s3, 128, %s417_s23, [#allocation6]  }
  0x69   : > { %p3041_p3 = pnand %p3040_p1, %p3034_p11 }
  0x6b   : > { %3044 = shalt.err (!%p3041_p3)
}
  0x6c   : > { %s3931_s17 = smov 4   ;;  %s3932_s22 = smov 64  }
  0x6d   : > { %s3933_s6 = sld [smem:[#allocation31_spill]]  ;;  %s3248_s2 = smov [#allocation13]  }
  0x6e   : > { %s468_s23 = sshll.u32 %s3248_s2, 4  ;;  %s3249_s26 = smov [#allocation16]   ;;  %s469_s23 = int_to_ptr.vmem [resolvable:$true] %s468_s23 }
  0x6f   : > { %s499_s5 = sshll.u32 %s3249_s26, 4  ;;  %s3056_s27 = scalar_lea.vmem %s469_s23, 256  ;;  %s500_s5 = int_to_ptr.vmem [resolvable:$true] %s499_s5 }
  0x70   : > { %p3057_p4 = scmp.ne.s32.totalorder %s469_s23, %s3056_s27  ;;  %p3064_p2 = scmp.lt.s32.totalorder %s469_s23, %s469_s23 }
  0x71   : > { %p3065_p5 = scmp.lt.s32.totalorder %s3056_s27, %s3056_s27 }
  0x72   : > { %p3059_p13 = pnand %p3057_p4, %p3390_p7 }
  0x73   : > { %2693 = dma.hbm_to_vmem [thread:$0]  (!%p3382_p6), %s3933_s6, 256, %s443_s30, [#allocation9], %s3932_s22, %s3932_s22, %s3931_s17  }
  0x74   : > { %p3060_p0 = pneg %p3059_p13  ;;  %p3066_p8 = por %p3065_p5, %p3064_p2 }
  0x76   : > { %p3067_p9 = pnand %p3066_p8, %p3060_p0 }
  0x78   : > { %3070 = shalt.err (!%p3067_p9)
}
  0x79   : > { %s3934_s8 = sld [smem:[#allocation33_spill]]  ;;  %s3082_s29 = scalar_lea.vmem %s500_s5, 128 }
  0x7a   : > { %p3083_p11 = scmp.ne.s32.totalorder %s500_s5, %s3082_s29  ;;  %p3090_p1 = scmp.lt.s32.totalorder %s500_s5, %s500_s5 }
  0x7b   : > { %p3091_p3 = scmp.lt.s32.totalorder %s3082_s29, %s3082_s29 }
  0x7c   : > { %p3085_p10 = pnand %p3083_p11, %p3390_p7 }
  0x7d   : > { %p3092_p4 = por %p3091_p3, %p3090_p1 }
  0x7e   : > { %p3086_p12 = pneg %p3085_p10 }
  0x7f   : > { %2699 = dma.hbm_to_vmem [thread:$0]  (!%p3382_p6), %s3934_s8, 256, %s469_s23, [#allocation12], %s3932_s22, %s3932_s22, %s3931_s17  }
  0x80   : > { %p3093_p13 = pnand %p3092_p4, %p3086_p12 }
  0x82   : > { %3096 = shalt.err (!%p3093_p13)
}
  0x83   : > { %s3935_s12 = sld [smem:[#allocation35_spill]]  ;;  %s3250_s2 = smov [#allocation19]  }
  0x84   : > { %s522_s23 = sshll.u32 %s3250_s2, 4  ;;  %s523_s23 = int_to_ptr.vmem [resolvable:$true] %s522_s23 }
  0x85   : > { %s3108_s26 = scalar_lea.vmem %s523_s23, 256  ;;  %p3116_p8 = scmp.lt.s32.totalorder %s523_s23, %s523_s23 }
  0x86   : > { %p3109_p0 = scmp.ne.s32.totalorder %s523_s23, %s3108_s26  ;;  %p3117_p9 = scmp.lt.s32.totalorder %s3108_s26, %s3108_s26 }
  0x88   : > { %p3111_p2 = pnand %p3109_p0, %p3390_p7  ;;  %p3118_p11 = por %p3117_p9, %p3116_p8 }
  0x89   : > { %2705 = dma.hbm_to_vmem [thread:$0]  (!%p3382_p6), %s3935_s12, 128, %s500_s5, [#allocation15]  }
  0x8a   : > { %p3112_p5 = pneg %p3111_p2 }
  0x8c   : > { %p3119_p10 = pnand %p3118_p11, %p3112_p5 }
  0x8e   : > { %3122 = shalt.err (!%p3119_p10)
}
  0x8f   : > { %s3936_s30 = smov 8   ;;  %s3937_s15 = smov 128  }
  0x90   : > { %s3938_s14 = sld [smem:[#allocation37_spill]]  ;;  %s2356_s28 = sadd.s32 4294967294, %s3235_s21  }
  0x91   : > { %s3494_s16 = sadd.s32 1, %s3235_s21   ;;  %s69_s7 = sadd.s32 1, %s3231_s20 }
  0x92   : > { %s66_s27 = ssub.s32 %s3235_s21, %s3494_s16  ;;  %p76_p12 = scmp.ne.s32.totalorder %s3231_s20, %s3227_s19 }
  0x93   : > { %p67_p7 = scmp.eq.s32.totalorder %s66_s27, 0  ;;  %p77_p1 = scmp.eq.s32.totalorder %s3235_s21, 0 }
  0x94   : > { %p82_p3 = scmp.ne.s32.totalorder %s3227_s19, %s3223_s18  ;;  %p3940_p13 = scmp.eq.s32.totalorder %s3366_s24, 0 }
  0x95   : > { %s3505_s2 = scalar_select %p67_p7, %s3231_s20, %s69_s7  }
  0x96   : > { %2711 = dma.hbm_to_vmem [thread:$0]  (!%p3382_p6), %s3938_s14, 256, %s523_s23, [#allocation18], %s3937_s15, %s3937_s15, %s3936_s30  }
  0x97   : > { %p3507_p4 = por %p77_p1, %p76_p12  ;;  %p3513_p6 = por %p3940_p13, %p82_p3 }
  0x98   : > { %p379_p0 = scmp.eq.s32.totalorder %s3366_s24, 1  ;;  %p385_p2 = scmp.eq.s32.totalorder %s2356_s28, 1 }
  0x99   : > { %s3941_s23 = scalar_select %p3513_p6, 1, 0 }
  0x9a   : > { %p2730_p5 = scmp.lt.s32.totalorder %s3235_s21, 2  ;;  %s543_s30 = sand.u32 1, %s3231_s20  }
  0x9b   : > { %p3520_p8 = por %p379_p0, %p76_p12  ;;  %p3524_p9 = por %p385_p2, %p82_p3 }
  0x9c   : > { %s2369_s5 = sshll.u32 %s543_s30, 3  ;;  %s2436_s27 = sshll.u32 %s3235_s21, 7 }
  0x9d   : > { %s3942_s15 = scalar_select %p3520_p8, 1, 0 }
  0x9e   : > { %s3943_s29 = scalar_select %p3524_p9, 1, 0 }
  0x9f   : > { %s3532_s6 = scalar_lea.hbm %s3885_s1, %s2436_s27  ;;  %s547_s28 = scalar_lea.vmem [#allocation2], %s2369_s5 }
  0xa0   : > { %s554_s8 = sshll.u32 %s547_s28, 4  ;;  %p3538_p11 = pnand %p2730_p5, %p3507_p4  ;;  %s3534_s8 = int_to_ptr.vmem [resolvable:$true] %s554_s8 }
  0xa1   : > { %s3542_s12 = scalar_lea.sflag [#allocation3], %s543_s30  ;;  %s3123_s13 = scalar_lea.hbm %s3532_s6, 128 }
  0xa2   : > { %p3124_p10 = scmp.ne.s32.totalorder %s3532_s6, %s3123_s13  ;;  %p3125_p7 = pneg %p3538_p11 }
  0xa3   : > { %s3128_s5 = scalar_lea.hbm %s3885_s1, 256  ;;  %p3129_p3 = scmp.lt.s32.totalorder %s3532_s6, %s3885_s1 }
  0xa4   : > { %p3126_p12 = pnand %p3125_p7, %p3124_p10  ;;  %p3130_p4 = scmp.lt.s32.totalorder %s3128_s5, %s3123_s13 }
  0xa6   : > { %p3127_p1 = pneg %p3126_p12  ;;  %p3131_p13 = por %p3130_p4, %p3129_p3 }
  0xa8   : > { %p3132_p0 = pnand %p3131_p13, %p3127_p1 }
  0xaa   : > { %3135 = shalt.err (!%p3132_p0)
}
  0xab   : > { %s3136_s26 = scalar_lea.vmem %s3534_s8, 128  ;;  %s3251_s30 = smov [#allocation2]  }
  0xac   : > { %p3137_p2 = scmp.ne.s32.totalorder %s3534_s8, %s3136_s26  ;;  %s3141_s14 = sshll.u32 %s3251_s30, 4  ;;  %s3142_s14 = int_to_ptr.vmem [resolvable:$false] %s3141_s14 }
  0xad   : > { %s3143_s3 = scalar_lea.vmem %s3142_s14, 256  ;;  %p3144_p12 = scmp.lt.s32.totalorder %s3534_s8, %s3142_s14 }
  0xae   : > { %p3139_p5 = pnand %p3137_p2, %p3125_p7  ;;  %p3145_p9 = scmp.lt.s32.totalorder %s3143_s3, %s3136_s26 }
  0xb0   : > { %p3140_p10 = pneg %p3139_p5  ;;  %p3146_p8 = por %p3145_p9, %p3144_p12 }
  0xb2   : > { %p3147_p6 = pnand %p3146_p8, %p3140_p10 }
  0xb4   : > { %3150 = shalt.err (!%p3147_p6)
}
  0xb5   : > { %2715 = dma.hbm_to_vmem [thread:$0]  (!%p3538_p11), %s3532_s6, 128, %s3534_s8, %s3542_s12, %s3932_s22, %s3932_s22, %s3931_s17  }
  0xb6   : > { %p3945_p7 = scmp.ne.s32.totalorder %s3922_s25, 0 }
  0xb7   : > { %s3569_s13 = sand.u32 (!%p3945_p7), 1, %s3227_s19   ;;  %p3946_p6 = scmp.ne.s32.totalorder (!%p3945_p7), %s3941_s23, 0 }
  0xb8   : > { %566 = sbr.rel (%p3945_p7) target bundleno = 3958 (0xf76), region = 80  ;;  %s2373_s14 = sshll.u32 (!%p3945_p7), %s3569_s13, 3 }
  0xb9   : > { %s569_s27 = scalar_lea.sflag (!%p3945_p7), [#allocation3], %s3569_s13  ;;  %s3575_s11 = scalar_lea.vmem (!%p3945_p7), [#allocation2], %s2373_s14 }
  0xbd   : > { %3194 = dma.done.wait (%p3946_p6), %s569_s27, 128  }
  0xbe   : > { %3196 = vsyncadd (%p3946_p6), %s569_s27, 4294967168  ;;  %p3947_p8 = scmp.eq.s32.totalorder %s3366_s24, 0 }
  0xc0   : > { %3198 = dma.done.wait (%p3947_p8), [#allocation6], 192   ;;  %p3948_p9 = pmov %p3947_p8 }
  0xc1   : > { %p3949_p11 = pmov %p3947_p8 }
  0xc2   : > { %3200 = vsyncadd (%p3948_p9), [#allocation6], 4294967104 }
  0xc3   : > { %3202 = dma.done.wait (%p3949_p11), [#allocation9], 512   ;;  %p3950_p1 = pmov %p3947_p8 }
  0xc5   : > { %3204 = vsyncadd (%p3950_p1), [#allocation9], 4294966784  ;;  %p3951_p3 = pmov %p3950_p1 }
  0xc6   : > { %p3952_p4 = pmov %p3950_p1 }
  0xc7   : > { %3206 = dma.done.wait (%p3951_p3), [#allocation12], 512  }
  0xc8   : > { %3208 = vsyncadd (%p3952_p4), [#allocation12], 4294966784  ;;  %p3953_p13 = pmov %p3950_p1 }
  0xc9   : > { %p3954_p0 = pmov %p3950_p1 }
  0xca   : > { %3210 = dma.done.wait (%p3953_p13), [#allocation15], 256  }
  0xcb   : > { %3212 = vsyncadd (%p3954_p0), [#allocation15], 4294967040  ;;  %p3955_p2 = pmov %p3954_p0 }
  0xcc   : > { %p3956_p5 = pmov %p3954_p0 }
  0xcd   : > { %3214 = dma.done.wait (%p3955_p2), [#allocation18], 512  }
  0xce   : > { %3216 = vsyncadd (%p3956_p5), [#allocation18], 4294966784  ;;  %p663_p10 = scmp.lt.s32.totalorder %s3366_s24, 1  ;;  %vm679_vm0 = vcmask 261120   ;;  %v2800_v3 = vld [vmem:[%s3888_s4 + $0x14] ss:$8 sps:$4 sm:$0xff]  }
  0xcf   : > { %v2802_v4 = vld [vmem:[%s3888_s4 + $0x10] ss:$8 sps:$4 sm:$0xff]   ;;  %v2803_v5 = vld [vmem:[%s3888_s4 + $0x4] ss:$8 sps:$4 sm:$0xff]   ;;  %733 = vmatprep.subr.bf16.mxu1 %v2800_v3  ;;  %v3252_v6 = vmov 0   ;;  %v3623_v8 = vld [vmem:[#allocation14] sm:$0xff] }
  0xd0   : > { %s664_s6 = scalar_select %p663_p10, %s3366_s24, 1  ;;  %753 = vmatprep.mubr.bf16.mxu1 %v3252_v6  ;;  %734 = vmatpush1.bf16.msra.mxu1 %v2802_v4  ;;  %v2805_v7 = vld [vmem:[%s3888_s4] ss:$8 sps:$4 sm:$0xff]   ;;  %v2386_v14 = vld [vmem:[#allocation5] ss:$0 sm:$0xff]  ;;  %v3256_v24 = vmov 0.0  }
  0xd1   : > { %735 = vmatprep.subr.bf16.mxu1 %v2803_v5  ;;  %v672_v9 = vld [vmem:[#allocation16] sm:$0xff]  ;;  %s3253_s27 = smov 64   ;;  %2495 = vmatprep.subr.bf16.mxu0 %v3256_v24  ;;  %vm3257_vm1 = vmmov 0   ;;  %s3258_s12 = smov 120   ;;  %vm814_vm2 = vcmask 64512   ;;  %vm1048_vm3 = vcmask 1043456  }
  0xd2   : > { %s2385_s8 = sshll.u32 %s664_s6, 3  ;;  %774 = vrot.lane.b32.xlu1 %v3623_v8, %s3253_s27  ;;  %s3254_s6 = smov 96   ;;  %2497 = vmatprep.mubr.msk.bf16.mxu0 %vm3257_vm1, %v3256_v24  ;;  %v787_v52 = vld [vmem:[#allocation7] sm:$0xff]  ;;  %vm1251_vm4 = vcmask 130048   ;;  %vm1253_vm5 = vcmask 195584   ;;  %vm2119_vm6 = vcmask 523264  }
  0xd3   : > { %s666_s17 = scalar_lea.vmem %s3884_s0, %s2385_s8  ;;  %s3255_s8 = smov 32  }
  0xd4   : > { %v3606_v0 = vld [vmem:[%s666_s17] sm:$0xff]  ;;  %736 = vmatpush1.bf16.msra.mxu1 %v2805_v7  ;;  %s3259_s25 = smov 112   ;;  %s3260_s17 = smov 104  }
  0xd5   : > { %v678_v1 = vmul.f32 %v3606_v0, %v3606_v0  ;;  %2489 = vmatprep.subr.bf16.mxu1 %v3256_v24  ;;  %s3261_s22 = smov 8   ;;  %s3262_s23 = smov 16  }
  0xd6   : > { %s3263_s5 = smov 24   ;;  %s3957_s28 = sld [smem:[#allocation38_spill]] }
  0xd7   : > { %v680_v2 = vsel %vm679_vm0, %v678_v1, 0.0  ;;  %p3958_p7 = scmp.ne.s32.totalorder %s3942_s15, 0 }
  0xd8   : > { %681 = vadd.xlane.f32.xlu0 %v680_v2 }
  0xee   : > { %778 = vrot.lane.b32.xlu0 %v672_v9, %s3254_s6 }
 0x144   : > { %v775_v25 = vpop.permute.xlu1 %774 }
 0x161   : > { %v682_v10 = vpop.xlane.xlu0 %681 }
 0x162   : > { %v684_v11 = vmul.f32 0.03125, %v682_v10 }
 0x164   : > { %v685_v12 = vadd.f32 1e-05, %v684_v11 }
 0x165   : > { %v779_v18 = vpop.permute.xlu0 %778 }
 0x166   : > { %2821 = vrsqrt.f32 %v685_v12 }
 0x173   : > { %v2822_v13 = vpop.eup %2821 }
 0x174   : > { %v687_v15 = vmul.f32 %v2822_v13, %v3606_v0 }
 0x176   : > { %v692_v16 = vmul.f32 %v2386_v14, %v687_v15 }
 0x178   : > { %v693_v17 = vpack.c.bf16 %v692_v16, %v692_v16 }
 0x17a   : > { %2391 = vmatmul.mubr.msk.bf16.vlgmr.msra.gmra.mxu1 %vm679_vm0, %v693_v17 }
 0x17b   : > { %2491 = vmatprep.mubr.msk.bf16.mxu1 %vm3257_vm1, %v3256_v24 }
 0x23a   : > { %v755_v19 = vpop.f32.mrf.mxu1 }
 0x23b   : > { %v781_v20 = vmul.f32 %v779_v18, %v755_v19  ;;  %v777_v26 = vmul.f32 %v775_v25, %v755_v19  ;;  %v762_v34 = vmul.f32 %v755_v19, %v3623_v8 }
 0x23c   : > { %v757_v21 = vpop.f32.mrf.mxu1 }
 0x23d   : > { %783 = vrot.lane.b32.xlu1 %v781_v20, %s3254_s6  ;;  %v804_v47 = vpack.c.bf16 %v757_v21, %v757_v21 }
 0x23e   : > { %v759_v22 = vpop.f32.mrf.mxu1 }
 0x23f   : > { %v1050_v50 = vsel %vm1048_vm3, %v804_v47, 0 }
 0x240   : > { %v760_v23 = vpop.f32.mrf.mxu1 }
 0x241   : > { %764 = vrot.lane.b32.xlu1 %v672_v9, %s3255_s8 }
 0x2af   : > { %v784_v27 = vpop.permute.xlu1 %783 }
 0x2b0   : > { %v786_v28 = vadd.f32 %v784_v27, %v777_v26 }
 0x2b2   : > { %v796_v29 = vpack.c.bf16 %v786_v28, %v786_v28 }
 0x2b3   : > { %v3638_v30 = vpop.permute.xlu1 %764 }
 0x2b4   : > { %v767_v31 = vmul.f32 %v3638_v30, %v755_v19  ;;  %812 = vrot.lane.b32.xlu0 %v796_v29, %s3253_s27 }
 0x2b6   : > { %769 = vrot.lane.b32.xlu1 %v767_v31, %s3254_s6 }
 0x2ba   : > { %798 = vrot.lane.b32.xlu1 %v796_v29, %s3258_s12 }
 0x2be   : > { %800 = vrot.lane.b32.xlu1 %v796_v29, %s3259_s25 }
 0x2c2   : > { %802 = vrot.lane.b32.xlu1 %v796_v29, %s3260_s17 }
 0x326   : > { %v813_v32 = vpop.permute.xlu0 %812 }
 0x327   : > { %v819_v33 = vsel %vm814_vm2, %v813_v32, 0 }
 0x328   : > { %2490 = vmatpush3.bf16.xpose.msra.mxu1 %v819_v33  ;;  %v770_v35 = vpop.permute.xlu1 %769 }
 0x329   : > { %v772_v36 = vadd.f32 %v770_v35, %v762_v34  ;;  %2501 = vmatprep.subr.bf16.mxu1 %v3256_v24 }
 0x32b   : > { %v788_v38 = vpack.c.bf16 %v772_v36, %v772_v36 }
 0x32c   : > { %v799_v37 = vpop.permute.xlu1 %798 }
 0x32d   : > { %861 = vrot.lane.b32.xlu1 %v799_v37, %s3253_s27 }
 0x32f   : > { %2492 = vmatmul.mubr.msk.bf16.vlgmr.msra.gmra.mxu1 %vm814_vm2, %v788_v38 }
 0x330   : > { %v801_v39 = vpop.permute.xlu1 %800  ;;  %2503 = vmatprep.mubr.msk.bf16.mxu1 %vm3257_vm1, %v3256_v24 }
 0x331   : > { %790 = vrot.lane.b32.xlu1 %v788_v38, %s3258_s12  ;;  %909 = vrot.lane.b32.xlu0 %v801_v39, %s3253_s27 }
 0x334   : > { %v803_v40 = vpop.permute.xlu1 %802 }
 0x335   : > { %792 = vrot.lane.b32.xlu1 %v788_v38, %s3259_s25  ;;  %957 = vrot.lane.b32.xlu0 %v803_v40, %s3253_s27 }
 0x339   : > { %794 = vrot.lane.b32.xlu0 %v788_v38, %s3260_s17 }
 0x39f   : > { %v862_v41 = vpop.permute.xlu1 %861 }
 0x3a0   : > { %v867_v42 = vsel %vm814_vm2, %v862_v41, 0 }
 0x3a1   : > { %2496 = vmatpush3.bf16.xpose.msra.mxu0 %v867_v42 }
 0x3a2   : > { %2507 = vmatprep.subr.bf16.mxu0 %v3256_v24 }
 0x3a3   : > { %v910_v43 = vpop.permute.xlu0 %909  ;;  %v791_v45 = vpop.permute.xlu1 %790 }
 0x3a4   : > { %v915_v44 = vsel %vm814_vm2, %v910_v43, 0 }
 0x3a5   : > { %2502 = vmatpush3.bf16.xpose.msra.mxu1 %v915_v44 }
 0x3a6   : > { %2513 = vmatprep.subr.bf16.mxu1 %v3256_v24 }
 0x3a7   : > { %v958_v46 = vpop.permute.xlu0 %957  ;;  %v793_v49 = vpop.permute.xlu1 %792 }
 0x3a8   : > { %v963_v48 = vsel %vm814_vm2, %v958_v46, 0  ;;  %2498 = vmatmul.mubr.msk.bf16.vlgmr.msra.gmra.mxu0 %vm814_vm2, %v791_v45 }
 0x3a9   : > { %2508 = vmatpush3.bf16.xpose.msra.mxu0 %v963_v48  ;;  %2509 = vmatprep.mubr.msk.bf16.mxu0 %vm3257_vm1, %v3256_v24 }
 0x3aa   : > { %2519 = vmatprep.subr.bf16.mxu0 %v3256_v24 }
 0x3ab   : > { %v795_v51 = vpop.permute.xlu0 %794 }
 0x3ac   : > { %2504 = vmatmul.mubr.msk.bf16.vlgmr.msra.gmra.mxu1 %vm814_vm2, %v793_v49 }
 0x3ad   : > { %2514 = vmatpush3.bf16.msra.mxu1 %v1050_v50  ;;  %2515 = vmatprep.mubr.msk.bf16.mxu1 %vm3257_vm1, %v3256_v24 }
 0x3ae   : > { %2525 = vmatprep.subr.bf16.mxu1 %v3256_v24 }
 0x3b0   : > { %2510 = vmatmul.mubr.msk.bf16.vlgmr.msra.gmra.mxu0 %vm814_vm2, %v795_v51 }
 0x3b1   : > { %2521 = vmatprep.mubr.msk.bf16.mxu0 %vm3257_vm1, %v3256_v24 }
 0x3ef   : > { %v855_v53 = vpop.f32.mrf.mxu1 }
 0x3f0   : > { %v856_v54 = vadd.f32 %v855_v53, %v787_v52 }
 0x3f1   : > { %v2493_v55 = vpop.f32.mrf.mxu1 }
 0x3f2   : > { %v1005_v56 = vsel %vm814_vm2, %v856_v54, -inf  ;;  %v2807_v55 = vld [vmem:[#allocation8] sm:$0xff]  }
 0x3f3   : > { %v858_v57 = vpop.f32.mrf.mxu1  ;;  %1006 = vmax.xlane.f32.xlu1 %v1005_v56 }
 0x3f5   : > { %v2494_v58 = vpop.f32.mrf.mxu1 }
 0x404   : > { %808 = vrot.lane.b32.xlu1 %v804_v47, %s3259_s25 }
 0x468   : > { %v903_v59 = vpop.f32.mrf.mxu0 }
 0x469   : > { %v904_v60 = vadd.f32 %v903_v59, %v787_v52 }
 0x46a   : > { %v2499_v61 = vpop.f32.mrf.mxu0 }
 0x46b   : > { %v1008_v62 = vsel %vm814_vm2, %v904_v60, -inf }
 0x46c   : > { %1009 = vmax.xlane.f32.xlu0 %v1008_v62  ;;  %v906_v63 = vpop.f32.mrf.mxu0  ;;  %v951_v1 = vpop.f32.mrf.mxu1 }
 0x46d   : > { %v952_v2 = vadd.f32 %v951_v1, %v787_v52 }
 0x46e   : > { %v2500_v3 = vpop.f32.mrf.mxu0  ;;  %v2505_v4 = vpop.f32.mrf.mxu1 }
 0x46f   : > { %v1011_v5 = vsel %vm814_vm2, %v952_v2, -inf }
 0x470   : > { %v999_v6 = vpop.f32.mrf.mxu0  ;;  %1012 = vmax.xlane.f32.xlu0 %v1011_v5  ;;  %v954_v7 = vpop.f32.mrf.mxu1 }
 0x471   : > { %v1000_v9 = vadd.f32 %v999_v6, %v787_v52 }
 0x472   : > { %v2506_v10 = vpop.f32.mrf.mxu1  ;;  %v2511_v11 = vpop.f32.mrf.mxu0 }
 0x473   : > { %v1014_v12 = vsel %vm814_vm2, %v1000_v9, -inf }
 0x474   : > { %1015 = vmax.xlane.f32.xlu1 %v1014_v12  ;;  %v1002_v13 = vpop.f32.mrf.mxu0 }
 0x476   : > { %v2512_v14 = vpop.f32.mrf.mxu0 }
 0x47c   : > { %v1007_v15 = vpop.xlane.xlu1 %1006 }
 0x47d   : > { %v1017_v16 = vsub.f32 %v856_v54, %v1007_v15  ;;  %v2806_v54 = vld [vmem:[#allocation8 + $0x8] sm:$0xff]  }
 0x47f   : > { %v1021_v17 = vmul.f32 1.442695, %v1017_v16 }
 0x480   : > { %v809_v19 = vpop.permute.xlu1 %808 }
 0x481   : > { %2823 = vpow2.f32 %v1021_v17  ;;  %v1142_v21 = vsel %vm1048_vm3, %v809_v19, 0 }
 0x485   : > { %810 = vrot.lane.b32.xlu1 %v804_v47, %s3260_s17 }
 0x486   : > { %806 = vrot.lane.b32.xlu0 %v804_v47, %s3258_s12 }
 0x48e   : > { %v2824_v18 = vpop.eup %2823 }
 0x48f   : > { %v1041_v20 = vpack.c.bf16 %v2824_v18, %v2824_v18  ;;  %v1029_v46 = vsel %vm814_vm2, %v2824_v18, 0.0 }
 0x491   : > { %2516 = vmatmul.mubr.msk.bf16.vlgmr.msra.gmra.mxu1 %vm814_vm2, %v1041_v20 }
 0x492   : > { %2526 = vmatpush3.bf16.msra.mxu1 %v1142_v21  ;;  %2527 = vmatprep.mubr.msk.bf16.mxu1 %vm3257_vm1, %v3256_v24 }
 0x493   : > { %2537 = vmatprep.subr.bf16.mxu1 %v3256_v24 }
 0x4f5   : > { %v1010_v22 = vpop.xlane.xlu0 %1009 }
 0x4f6   : > { %v1018_v23 = vsub.f32 %v904_v60, %v1010_v22  ;;  %v2808_v22 = vld [vmem:[#allocation11 + $0x8] sm:$0xff]  }
 0x4f8   : > { %v1023_v25 = vmul.f32 1.442695, %v1018_v23  ;;  %v675_v23 = vld [vmem:[#allocation19] sm:$0xff] }
 0x4f9   : > { %v1013_v26 = vpop.xlane.xlu0 %1012 }
 0x4fa   : > { %2825 = vpow2.f32 %v1023_v25  ;;  %v1019_v27 = vsub.f32 %v952_v2, %v1013_v26  ;;  %v2809_v25 = vld [vmem:[#allocation11] sm:$0xff]   ;;  %v676_v26 = vld [vmem:[#allocation19 + $0x8] sm:$0xff] }
 0x4fc   : > { %v1025_v28 = vmul.f32 1.442695, %v1019_v27  ;;  %v2810_v27 = vld [vmem:[%s3575_s11] sm:$0xff]  }
 0x4fd   : > { %v807_v29 = vpop.permute.xlu0 %806  ;;  %v1016_v31 = vpop.xlane.xlu1 %1015 }
 0x4fe   : > { %2827 = vpow2.f32 %v1025_v28  ;;  %v1096_v32 = vsel %vm1048_vm3, %v807_v29, 0  ;;  %v1020_v33 = vsub.f32 %v1000_v9, %v1016_v31 }
 0x4ff   : > { %2520 = vmatpush3.bf16.msra.mxu0 %v1096_v32 }
 0x500   : > { %v1027_v34 = vmul.f32 1.442695, %v1020_v33  ;;  %2531 = vmatprep.subr.bf16.mxu0 %v3256_v24 }
 0x501   : > { %v811_v36 = vpop.permute.xlu1 %810 }
 0x502   : > { %2829 = vpow2.f32 %v1027_v34  ;;  %v1188_v39 = vsel %vm1048_vm3, %v811_v36, 0  ;;  %v2811_v36 = vld [vmem:[#allocation10 + $0x8] sm:$0xff]  }
 0x507   : > { %v2826_v35 = vpop.eup %2825 }
 0x508   : > { %v1032_v37 = vsel %vm814_vm2, %v2826_v35, 0.0  ;;  %v1042_v38 = vpack.c.bf16 %v2826_v35, %v2826_v35 }
 0x509   : > { %1033 = vadd.xlane.f32.xlu0 %v1032_v37  ;;  %v2812_v37 = vld [vmem:[#allocation10] sm:$0xff]  }
 0x50a   : > { %2522 = vmatmul.mubr.msk.bf16.vlgmr.msra.gmra.mxu0 %vm814_vm2, %v1042_v38 }
 0x50b   : > { %v2828_v40 = vpop.eup %2827  ;;  %2532 = vmatpush3.bf16.msra.mxu0 %v1188_v39  ;;  %2533 = vmatprep.mubr.msk.bf16.mxu0 %vm3257_vm1, %v3256_v24 }
 0x50c   : > { %v1035_v41 = vsel %vm814_vm2, %v2828_v40, 0.0  ;;  %v1043_v42 = vpack.c.bf16 %v2828_v40, %v2828_v40  ;;  %2545 = vmatprep.subr.bf16.mxu0 %v3256_v24 }
 0x50d   : > { %1036 = vadd.xlane.f32.xlu1 %v1035_v41 }
 0x50e   : > { %2528 = vmatmul.mubr.msk.bf16.vlgmr.msra.gmra.mxu1 %vm814_vm2, %v1043_v42 }
 0x50f   : > { %v2830_v43 = vpop.eup %2829  ;;  %2541 = vmatprep.mubr.msk.bf16.mxu1 %vm3257_vm1, %v3256_v24  ;;  %2538 = vmatpush3.bf16.msra.mxu1 %v2806_v54  ;;  %v673_v54 = vld [vmem:[#allocation17] sm:$0xff] }
 0x510   : > { %v1038_v44 = vsel %vm814_vm2, %v2830_v43, 0.0  ;;  %v1044_v45 = vpack.c.bf16 %v2830_v43, %v2830_v43  ;;  %2539 = vmatprep.subr.bf16.mxu1 %v3256_v24 }
 0x511   : > { %1039 = vadd.xlane.f32.xlu0 %v1038_v44 }
 0x512   : > { %2534 = vmatmul.mubr.msk.bf16.vlgmr.msra.gmra.mxu0 %vm814_vm2, %v1044_v45 }
 0x513   : > { %2549 = vmatprep.mubr.msk.bf16.mxu0 %vm3257_vm1, %v3256_v24  ;;  %2540 = vmatpush3.bf16.msra.mxu1 %v2807_v55  ;;  %v674_v55 = vld [vmem:[#allocation17 + $0x8] sm:$0xff] }
 0x514   : > { %2553 = vmatprep.subr.bf16.mxu1 %v3256_v24  ;;  %2546 = vmatpush3.bf16.msra.mxu0 %v2811_v36 }
 0x515   : > { %1030 = vadd.xlane.f32.xlu0 %v1029_v46  ;;  %2547 = vmatprep.subr.bf16.mxu0 %v3256_v24 }
 0x518   : > { %2548 = vmatpush3.bf16.msra.mxu0 %v2812_v37 }
 0x519   : > { %2561 = vmatprep.subr.bf16.mxu0 %v3256_v24 }
 0x551   : > { %v1086_v47 = vpop.f32.mrf.mxu1 }
 0x553   : > { %v2517_v48 = vpop.f32.mrf.mxu1 }
 0x555   : > { %v1089_v49 = vpop.f32.mrf.mxu1 }
 0x557   : > { %v2518_v50 = vpop.f32.mrf.mxu1 }
 0x558   : > { %v2403_v50 = vld [vmem:[#allocation5 + $0x1] ss:$0 sm:$0xff] }
 0x592   : > { %v1034_v51 = vpop.xlane.xlu0 %1033 }
 0x593   : > { %2831 = vrcp.f32 %v1034_v51 }
 0x596   : > { %v1037_v52 = vpop.xlane.xlu1 %1036 }
 0x597   : > { %2833 = vrcp.f32 %v1037_v52 }
 0x59a   : > { %v1040_v53 = vpop.xlane.xlu0 %1039 }
 0x59b   : > { %2835 = vrcp.f32 %v1040_v53 }
 0x59e   : > { %v1031_v12 = vpop.xlane.xlu0 %1030 }
 0x59f   : > { %2837 = vrcp.f32 %v1031_v12 }
 0x5a0   : > { %v2832_v56 = vpop.eup %2831 }
 0x5a4   : > { %v2834_v60 = vpop.eup %2833 }
 0x5a8   : > { %v2836_v3 = vpop.eup %2835 }
 0x5ac   : > { %v2838_v13 = vpop.eup %2837 }
 0x5ad   : > { %v1234_v15 = vmul.f32 %v2838_v13, %v1086_v47 }
 0x5ca   : > { %v1132_v57 = vpop.f32.mrf.mxu0 }
 0x5cb   : > { %v1235_v58 = vmul.f32 %v2832_v56, %v1132_v57 }
 0x5cc   : > { %v2523_v59 = vpop.f32.mrf.mxu0 }
 0x5cd   : > { %1239 = vrot.lane.b32.xlu1 %v1235_v58, %s3261_s22 }
 0x5ce   : > { %v1135_v61 = vpop.f32.mrf.mxu0  ;;  %v1178_v62 = vpop.f32.mrf.mxu1 }
 0x5cf   : > { %v1236_v63 = vmul.f32 %v2834_v60, %v1178_v62 }
 0x5d0   : > { %v2524_v1 = vpop.f32.mrf.mxu0  ;;  %v2529_v2 = vpop.f32.mrf.mxu1 }
 0x5d1   : > { %1243 = vrot.lane.b32.xlu0 %v1236_v63, %s3262_s23 }
 0x5d2   : > { %v1181_v4 = vpop.f32.mrf.mxu1  ;;  %v1224_v5 = vpop.f32.mrf.mxu0 }
 0x5d3   : > { %v1237_v6 = vmul.f32 %v2836_v3, %v1224_v5 }
 0x5d4   : > { %v2530_v7 = vpop.f32.mrf.mxu1  ;;  %v2535_v9 = vpop.f32.mrf.mxu0 }
 0x5d5   : > { %1247 = vrot.lane.b32.xlu1 %v1237_v6, %s3263_s5  ;;  %1466 = vrot.lane.b32.xlu0 %v675_v23, %s3255_s8 }
 0x5d6   : > { %v1227_v10 = vpop.f32.mrf.mxu0 }
 0x5d8   : > { %v2536_v11 = vpop.f32.mrf.mxu0 }
 0x5d9   : > { %1468 = vrot.lane.b32.xlu0 %v676_v26, %s3255_s8 }
 0x63f   : > { %v1240_v14 = vpop.permute.xlu1 %1239 }
 0x640   : > { %v1250_v17 = vsel %vm814_vm2, %v1234_v15, %v1240_v14 }
 0x643   : > { %v1244_v16 = vpop.permute.xlu0 %1243 }
 0x644   : > { %v1252_v18 = vsel %vm1251_vm4, %v1250_v17, %v1244_v16 }
 0x647   : > { %v1248_v19 = vpop.permute.xlu1 %1247  ;;  %v1467_v38 = vpop.permute.xlu0 %1466 }
 0x648   : > { %v1254_v20 = vsel %vm1253_vm5, %v1252_v18, %v1248_v19 }
 0x649   : > { %v1255_v21 = vpack.c.bf16 %v1254_v20, %v1254_v20 }
 0x64b   : > { %2542 = vmatmul.mubr.msk.bf16.vlgmr.msra.gmra.mxu1 %vm679_vm0, %v1255_v21  ;;  %v1469_v41 = vpop.permute.xlu0 %1468 }
 0x64c   : > { %2557 = vmatprep.mubr.msk.bf16.mxu1 %vm3257_vm1, %v3256_v24  ;;  %2554 = vmatpush3.bf16.msra.mxu1 %v2808_v22 }
 0x64d   : > { %2555 = vmatprep.subr.bf16.mxu1 %v3256_v24 }
 0x650   : > { %2556 = vmatpush3.bf16.msra.mxu1 %v2809_v25 }
 0x651   : > { %2567 = vmatprep.subr.bf16.mxu1 %v3256_v24 }
 0x653   : > { %2558 = vmatmul.mubr.msk.bf16.vlgmr.msra.gmra.mxu1 %vm679_vm0, %v2810_v27 }
 0x654   : > { %2569 = vmatprep.mubr.msk.bf16.mxu1 %vm3257_vm1, %v3256_v24 }
 0x70b   : > { %v1309_v28 = vpop.f32.mrf.mxu1 }
 0x70c   : > { %v3724_v29 = vadd.f32 %v1309_v28, %v3606_v0 }
 0x70d   : > { %v2543_v31 = vpop.f32.mrf.mxu1 }
 0x70e   : > { %v1317_v32 = vmul.f32 %v3724_v29, %v3724_v29 }
 0x70f   : > { %v1312_v33 = vpop.f32.mrf.mxu1 }
 0x710   : > { %v1318_v34 = vsel %vm679_vm0, %v1317_v32, 0.0 }
 0x711   : > { %1319 = vadd.xlane.f32.xlu1 %v1318_v34  ;;  %v2544_v35 = vpop.f32.mrf.mxu1 }
 0x713   : > { %v1448_v0 = vpop.f32.mrf.mxu1 }
 0x714   : > { %v1472_v39 = vmul.f32 %v1467_v38, %v1448_v0  ;;  %v1462_v56 = vmul.f32 %v1448_v0, %v673_v54 }
 0x715   : > { %v2559_v40 = vpop.f32.mrf.mxu1 }
 0x716   : > { %1476 = vrot.lane.b32.xlu0 %v1472_v39, %s3254_s6 }
 0x717   : > { %v1451_v42 = vpop.f32.mrf.mxu1 }
 0x718   : > { %v1473_v43 = vmul.f32 %v1469_v41, %v1451_v42  ;;  %v1500_v44 = vpack.c.bf16 %v1451_v42, %v1448_v0  ;;  %v1463_v58 = vmul.f32 %v1451_v42, %v674_v55 }
 0x719   : > { %v2560_v45 = vpop.f32.mrf.mxu1 }
 0x71a   : > { %1478 = vrot.lane.b32.xlu0 %v1473_v43, %s3254_s6 }
 0x788   : > { %v1477_v57 = vpop.permute.xlu0 %1476 }
 0x789   : > { %v1482_v59 = vadd.f32 %v1477_v57, %v1462_v56 }
 0x78c   : > { %v1479_v60 = vpop.permute.xlu0 %1478 }
 0x78d   : > { %v1483_v61 = vadd.f32 %v1479_v60, %v1463_v58 }
 0x78f   : > { %v1492_v62 = vpack.c.bf16 %v1483_v61, %v1482_v59 }
 0x791   : > { %v1512_v63 = vsel %vm814_vm2, %v1492_v62, 0 }
 0x79a   : > { %v1320_v46 = vpop.xlane.xlu1 %1319 }
 0x79b   : > { %v1321_v47 = vmul.f32 0.03125, %v1320_v46 }
 0x79d   : > { %v1322_v48 = vadd.f32 1e-05, %v1321_v47 }
 0x79f   : > { %2839 = vrsqrt.f32 %v1322_v48 }
 0x7ac   : > { %v2840_v49 = vpop.eup %2839 }
 0x7ad   : > { %v1324_v51 = vmul.f32 %v2840_v49, %v3724_v29 }
 0x7af   : > { %v1329_v52 = vmul.f32 %v2403_v50, %v1324_v51 }
 0x7b1   : > { %v1330_v53 = vpack.c.bf16 %v1329_v52, %v1329_v52 }
 0x7b3   : > { %2550 = vmatmul.mubr.msk.bf16.vlgmr.msra.gmra.mxu0 %vm679_vm0, %v1330_v53 }
 0x7b4   : > { %2563 = vmatprep.mubr.msk.bf16.mxu0 %vm3257_vm1, %v3256_v24  ;;  %2562 = vmatpush3.bf16.xpose.msra.mxu0 %v1512_v63 }
 0x7b5   : > { %2573 = vmatprep.subr.bf16.mxu0 %v3256_v24 }
 0x873   : > { %v1384_v1 = vpop.f32.mrf.mxu0 }
 0x874   : > { %v1456_v2 = vmul.f32 %v1384_v1, %v3638_v30  ;;  %v1455_v6 = vmul.f32 %v1384_v1, %v3623_v8 }
 0x875   : > { %v2551_v3 = vpop.f32.mrf.mxu0 }
 0x876   : > { %1458 = vrot.lane.b32.xlu0 %v1456_v2, %s3254_s6 }
 0x877   : > { %v1387_v4 = vpop.f32.mrf.mxu0 }
 0x879   : > { %v2552_v5 = vpop.f32.mrf.mxu0 }
 0x87a   : > { %1494 = vrot.lane.b32.xlu0 %v1492_v62, %s3258_s12 }
 0x87e   : > { %1496 = vrot.lane.b32.xlu0 %v1492_v62, %s3259_s25 }
 0x8e8   : > { %v1459_v7 = vpop.permute.xlu0 %1458 }
 0x8e9   : > { %v1461_v9 = vadd.f32 %v1459_v7, %v1455_v6 }
 0x8eb   : > { %v1484_v10 = vpack.c.bf16 %v1461_v9, %v1461_v9 }
 0x8ec   : > { %v1495_v11 = vpop.permute.xlu0 %1494 }
 0x8ed   : > { %v1558_v12 = vsel %vm814_vm2, %v1495_v11, 0  ;;  %1488 = vrot.lane.b32.xlu1 %v1484_v10, %s3259_s25  ;;  %1486 = vrot.lane.b32.xlu0 %v1484_v10, %s3258_s12 }
 0x8ee   : > { %2564 = vmatmul.mubr.msk.bf16.vlgmr.msra.gmra.mxu0 %vm814_vm2, %v1484_v10  ;;  %2568 = vmatpush3.bf16.xpose.msra.mxu1 %v1558_v12 }
 0x8ef   : > { %2575 = vmatprep.mubr.msk.bf16.mxu0 %vm3257_vm1, %v3256_v24  ;;  %2579 = vmatprep.subr.bf16.mxu1 %v3256_v24 }
 0x8f0   : > { %v1497_v30 = vpop.permute.xlu0 %1496 }
 0x8f1   : > { %v1604_v8 = vsel %vm814_vm2, %v1497_v30, 0  ;;  %1732 = vrot.lane.b32.xlu1 %v1500_v44, %s3253_s27  ;;  %1498 = vrot.lane.b32.xlu0 %v1492_v62, %s3260_s17 }
 0x8f2   : > { %2574 = vmatpush3.bf16.xpose.msra.mxu0 %v1604_v8 }
 0x8f3   : > { %2585 = vmatprep.subr.bf16.mxu0 %v3256_v24 }
 0x8f5   : > { %1490 = vrot.lane.b32.xlu0 %v1484_v10, %s3260_s17 }
 0x8f9   : > { %1502 = vrot.lane.b32.xlu0 %v1500_v44, %s3258_s12 }
 0x8fd   : > { %1504 = vrot.lane.b32.xlu0 %v1500_v44, %s3259_s25 }
 0x901   : > { %1506 = vrot.lane.b32.xlu0 %v1500_v44, %s3260_s17 }
 0x95f   : > { %v1489_v13 = vpop.permute.xlu1 %1488  ;;  %v1487_v14 = vpop.permute.xlu0 %1486 }
 0x960   : > { %2570 = vmatmul.mubr.msk.bf16.vlgmr.msra.gmra.mxu1 %vm814_vm2, %v1487_v14  ;;  %2576 = vmatmul.mubr.msk.bf16.vlgmr.msra.gmra.mxu0 %vm814_vm2, %v1489_v13  ;;  %v2813_v13 = vld [vmem:[#allocation13 + $0x8] sm:$0xff]  }
 0x961   : > { %2581 = vmatprep.mubr.msk.bf16.mxu1 %vm3257_vm1, %v3256_v24  ;;  %2587 = vmatprep.mubr.msk.bf16.mxu0 %vm3257_vm1, %v3256_v24 }
 0x963   : > { %v1733_v15 = vpop.permute.xlu1 %1732  ;;  %v1499_v16 = vpop.permute.xlu0 %1498 }
 0x964   : > { %v1650_v17 = vsel %vm814_vm2, %v1499_v16, 0  ;;  %2586 = vmatpush3.bf16.msra.mxu0 %v1733_v15 }
 0x965   : > { %2580 = vmatpush3.bf16.xpose.msra.mxu1 %v1650_v17  ;;  %2597 = vmatprep.subr.bf16.mxu0 %v3256_v24 }
 0x966   : > { %2591 = vmatprep.subr.bf16.mxu1 %v3256_v24 }
 0x967   : > { %v1491_v18 = vpop.permute.xlu0 %1490 }
 0x96b   : > { %v1503_v25 = vpop.permute.xlu0 %1502 }
 0x96c   : > { %2582 = vmatmul.mubr.msk.bf16.vlgmr.msra.gmra.mxu1 %vm814_vm2, %v1491_v18 }
 0x96d   : > { %2593 = vmatprep.mubr.msk.bf16.mxu1 %vm3257_vm1, %v3256_v24 }
 0x96f   : > { %v1505_v26 = vpop.permute.xlu0 %1504 }
 0x973   : > { %v1507_v27 = vpop.permute.xlu0 %1506 }
 0x9ae   : > { %v1548_v19 = vpop.f32.mrf.mxu0 }
 0x9af   : > { %v1692_v20 = vsel %vm1251_vm4, %v1548_v19, -inf }
 0x9b0   : > { %1693 = vmax.xlane.f32.xlu1 %v1692_v20  ;;  %v2565_v21 = vpop.f32.mrf.mxu0 }
 0x9b2   : > { %v1551_v22 = vpop.f32.mrf.mxu0 }
 0x9b4   : > { %v2566_v23 = vpop.f32.mrf.mxu0 }
 0x9c1   : > { %1824 = vrot.lane.b32.xlu1 %v1505_v26, %s3253_s27 }
 0x9c5   : > { %1870 = vrot.lane.b32.xlu1 %v1507_v27, %s3253_s27 }
 0xa20   : > { %v1594_v28 = vpop.f32.mrf.mxu1  ;;  %v1640_v31 = vpop.f32.mrf.mxu0 }
 0xa21   : > { %v1695_v32 = vsel %vm1251_vm4, %v1594_v28, -inf  ;;  %v1698_v37 = vsel %vm1251_vm4, %v1640_v31, -inf }
 0xa22   : > { %v2577_v33 = vpop.f32.mrf.mxu0  ;;  %1696 = vmax.xlane.f32.xlu0 %v1695_v32  ;;  %v2571_v34 = vpop.f32.mrf.mxu1 }
 0xa24   : > { %v1597_v35 = vpop.f32.mrf.mxu1  ;;  %v1643_v36 = vpop.f32.mrf.mxu0 }
 0xa26   : > { %v2578_v38 = vpop.f32.mrf.mxu0  ;;  %1699 = vmax.xlane.f32.xlu0 %v1698_v37  ;;  %v2572_v0 = vpop.f32.mrf.mxu1 }
 0xa2c   : > { %v1686_v39 = vpop.f32.mrf.mxu1 }
 0xa2d   : > { %v1701_v40 = vsel %vm1251_vm4, %v1686_v39, -inf }
 0xa2e   : > { %1702 = vmax.xlane.f32.xlu0 %v1701_v40  ;;  %v2583_v41 = vpop.f32.mrf.mxu1 }
 0xa30   : > { %v1689_v42 = vpop.f32.mrf.mxu1 }
 0xa32   : > { %v2584_v43 = vpop.f32.mrf.mxu1 }
 0xa39   : > { %v1694_v44 = vpop.xlane.xlu1 %1693 }
 0xa3a   : > { %v1704_v45 = vsub.f32 %v1548_v19, %v1694_v44  ;;  %v2814_v19 = vld [vmem:[#allocation13] sm:$0xff]  }
 0xa3c   : > { %v1708_v46 = vmul.f32 1.442695, %v1704_v45 }
 0xa3d   : > { %v1825_v49 = vpop.permute.xlu1 %1824 }
 0xa3e   : > { %2841 = vpow2.f32 %v1708_v46 }
 0xa41   : > { %v1871_v63 = vpop.permute.xlu1 %1870 }
 0xa44   : > { %1778 = vrot.lane.b32.xlu0 %v1503_v25, %s3253_s27 }
 0xa4b   : > { %v2842_v47 = vpop.eup %2841 }
 0xa4c   : > { %v1728_v48 = vpack.c.bf16 %v2842_v47, %v2842_v47  ;;  %v1716_v7 = vsel %vm1251_vm4, %v2842_v47, 0.0 }
 0xa4e   : > { %2588 = vmatmul.mubr.msk.bf16.vlgmr.msra.gmra.mxu0 %vm1251_vm4, %v1728_v48 }
 0xa4f   : > { %2598 = vmatpush3.bf16.msra.mxu0 %v1825_v49  ;;  %2599 = vmatprep.mubr.msk.bf16.mxu0 %vm3257_vm1, %v3256_v24 }
 0xa50   : > { %2609 = vmatprep.subr.bf16.mxu0 %v3256_v24 }
 0xaab   : > { %v1697_v50 = vpop.xlane.xlu0 %1696 }
 0xaac   : > { %v1705_v51 = vsub.f32 %v1594_v28, %v1697_v50 }
 0xaae   : > { %v1710_v52 = vmul.f32 1.442695, %v1705_v51 }
 0xaaf   : > { %v1700_v53 = vpop.xlane.xlu0 %1699 }
 0xab0   : > { %2843 = vpow2.f32 %v1710_v52  ;;  %v1706_v54 = vsub.f32 %v1640_v31, %v1700_v53  ;;  %v2815_v53 = vld [vmem:[%s3893_s9 + $0x8] sm:$0xff]  }
 0xab2   : > { %v1712_v55 = vmul.f32 1.442695, %v1706_v54  ;;  %v2816_v54 = vld [vmem:[%s3893_s9] sm:$0xff]  }
 0xab4   : > { %2845 = vpow2.f32 %v1712_v55 }
 0xab7   : > { %v1703_v56 = vpop.xlane.xlu0 %1702 }
 0xab8   : > { %v1707_v57 = vsub.f32 %v1686_v39, %v1703_v56 }
 0xaba   : > { %v1714_v58 = vmul.f32 1.442695, %v1707_v57 }
 0xabb   : > { %v1779_v59 = vpop.permute.xlu0 %1778 }
 0xabc   : > { %2847 = vpow2.f32 %v1714_v58  ;;  %2592 = vmatpush3.bf16.msra.mxu1 %v1779_v59  ;;  %v2422_v58 = vld [vmem:[#allocation5 + $0x2] ss:$0 sm:$0xff] }
 0xabd   : > { %v2844_v60 = vpop.eup %2843  ;;  %2603 = vmatprep.subr.bf16.mxu1 %v3256_v24 }
 0xabe   : > { %v1719_v61 = vsel %vm1251_vm4, %v2844_v60, 0.0  ;;  %v1729_v62 = vpack.c.bf16 %v2844_v60, %v2844_v60 }
 0xabf   : > { %1720 = vadd.xlane.f32.xlu1 %v1719_v61 }
 0xac0   : > { %2594 = vmatmul.mubr.msk.bf16.vlgmr.msra.gmra.mxu1 %vm1251_vm4, %v1729_v62  ;;  %v2817_v62 = vld [vmem:[%s3894_s10 + $0x18] sm:$0xff]  }
 0xac1   : > { %v2846_v1 = vpop.eup %2845  ;;  %2604 = vmatpush3.bf16.msra.mxu1 %v1871_v63  ;;  %2605 = vmatprep.mubr.msk.bf16.mxu1 %vm3257_vm1, %v3256_v24  ;;  %v2818_v63 = vld [vmem:[%s3894_s10 + $0x10] sm:$0xff]  }
 0xac2   : > { %v1722_v2 = vsel %vm1251_vm4, %v2846_v1, 0.0  ;;  %v1730_v3 = vpack.c.bf16 %v2846_v1, %v2846_v1  ;;  %2617 = vmatprep.subr.bf16.mxu1 %v3256_v24  ;;  %v2819_v1 = vld [vmem:[%s3894_s10 + $0x8] sm:$0xff]  }
 0xac3   : > { %1723 = vadd.xlane.f32.xlu0 %v1722_v2  ;;  %v2820_v2 = vld [vmem:[%s3894_s10] sm:$0xff]  }
 0xac4   : > { %2600 = vmatmul.mubr.msk.bf16.vlgmr.msra.gmra.mxu0 %vm1251_vm4, %v1730_v3 }
 0xac5   : > { %2613 = vmatprep.mubr.msk.bf16.mxu0 %vm3257_vm1, %v3256_v24  ;;  %2610 = vmatpush3.bf16.msra.mxu0 %v2813_v13 }
 0xac6   : > { %2611 = vmatprep.subr.bf16.mxu0 %v3256_v24 }
 0xac9   : > { %v2848_v4 = vpop.eup %2847  ;;  %2612 = vmatpush3.bf16.msra.mxu0 %v2814_v19 }
 0xaca   : > { %v1725_v5 = vsel %vm1251_vm4, %v2848_v4, 0.0  ;;  %v1731_v6 = vpack.c.bf16 %v2848_v4, %v2848_v4  ;;  %2625 = vmatprep.subr.bf16.mxu0 %v3256_v24 }
 0xacb   : > { %1726 = vadd.xlane.f32.xlu0 %v1725_v5 }
 0xacc   : > { %2606 = vmatmul.mubr.msk.bf16.vlgmr.msra.gmra.mxu1 %vm1251_vm4, %v1731_v6 }
 0xacd   : > { %2621 = vmatprep.mubr.msk.bf16.mxu1 %vm3257_vm1, %v3256_v24  ;;  %2618 = vmatpush3.bf16.msra.mxu1 %v2815_v53 }
 0xace   : > { %2619 = vmatprep.subr.bf16.mxu1 %v3256_v24 }
 0xacf   : > { %1717 = vadd.xlane.f32.xlu0 %v1716_v7 }
 0xad1   : > { %2620 = vmatpush3.bf16.msra.mxu1 %v2816_v54 }
 0xb0e   : > { %v1772_v9 = vpop.f32.mrf.mxu0 }
 0xb10   : > { %v2589_v10 = vpop.f32.mrf.mxu0 }
 0xb12   : > { %v1775_v11 = vpop.f32.mrf.mxu0 }
 0xb14   : > { %v2590_v12 = vpop.f32.mrf.mxu0 }
 0xb48   : > { %v1721_v30 = vpop.xlane.xlu1 %1720 }
 0xb49   : > { %2849 = vrcp.f32 %v1721_v30 }
 0xb4c   : > { %v1724_v8 = vpop.xlane.xlu0 %1723 }
 0xb4d   : > { %2851 = vrcp.f32 %v1724_v8 }
 0xb54   : > { %v1727_v14 = vpop.xlane.xlu0 %1726 }
 0xb55   : > { %2853 = vrcp.f32 %v1727_v14 }
 0xb56   : > { %v2850_v15 = vpop.eup %2849 }
 0xb58   : > { %v1718_v37 = vpop.xlane.xlu0 %1717 }
 0xb59   : > { %2855 = vrcp.f32 %v1718_v37 }
 0xb5a   : > { %v2852_v20 = vpop.eup %2851 }
 0xb62   : > { %v2854_v31 = vpop.eup %2853 }
 0xb66   : > { %v2856_v38 = vpop.eup %2855 }
 0xb67   : > { %v1920_v39 = vmul.f32 %v2856_v38, %v1772_v9 }
 0xb80   : > { %v1818_v16 = vpop.f32.mrf.mxu1 }
 0xb81   : > { %v1921_v17 = vmul.f32 %v2850_v15, %v1818_v16 }
 0xb82   : > { %v2595_v18 = vpop.f32.mrf.mxu1 }
 0xb83   : > { %1925 = vrot.lane.b32.xlu1 %v1921_v17, %s3261_s22 }
 0xb84   : > { %v1821_v21 = vpop.f32.mrf.mxu1  ;;  %v1864_v22 = vpop.f32.mrf.mxu0 }
 0xb85   : > { %v1922_v23 = vmul.f32 %v2852_v20, %v1864_v22 }
 0xb86   : > { %v2596_v25 = vpop.f32.mrf.mxu1  ;;  %v2601_v26 = vpop.f32.mrf.mxu0 }
 0xb87   : > { %1929 = vrot.lane.b32.xlu0 %v1922_v23, %s3262_s23  ;;  %s662_s23 = scalar_lea.vmem [#allocation20], %s2373_s14  ;;  %s3264_s14 = smov [#allocation20]  }
 0xb88   : > { %v1867_v27 = vpop.f32.mrf.mxu0  ;;  %s3155_s3 = sshll.u32 %s3264_s14, 4  ;;  %s3156_s3 = int_to_ptr.vmem [resolvable:$false] %s3155_s3 }
 0xb89   : > { %s3157_s6 = scalar_lea.vmem %s3156_s3, 256 }
 0xb8a   : > { %v2602_v28 = vpop.f32.mrf.mxu0 }
 0xb8c   : > { %v1910_v32 = vpop.f32.mrf.mxu1 }
 0xb8d   : > { %v1923_v33 = vmul.f32 %v2854_v31, %v1910_v32 }
 0xb8e   : > { %v2607_v34 = vpop.f32.mrf.mxu1 }
 0xb8f   : > { %1933 = vrot.lane.b32.xlu1 %v1923_v33, %s3263_s5  ;;  %s2179_s5 = sshll.u32 %s662_s23, 4  ;;  %s3842_s5 = int_to_ptr.vmem [resolvable:$true] %s2179_s5 }
 0xb90   : > { %v1913_v35 = vpop.f32.mrf.mxu1  ;;  %s3151_s30 = scalar_lea.vmem %s3842_s5, 128  ;;  %p3158_p9 = scmp.lt.s32.totalorder %s3842_s5, %s3156_s3 }
 0xb91   : > { %p3152_p12 = scmp.ne.s32.totalorder %s3842_s5, %s3151_s30  ;;  %p3159_p11 = scmp.lt.s32.totalorder %s3157_s6, %s3151_s30 }
 0xb92   : > { %v2608_v36 = vpop.f32.mrf.mxu1 }
 0xb93   : > { %p3153_p6 = pnand %p3152_p12, %p3958_p7  ;;  %p3160_p1 = por %p3159_p11, %p3158_p9 }
 0xb95   : > { %p3154_p8 = pneg %p3153_p6 }
 0xb97   : > { %p3161_p3 = pnand %p3160_p1, %p3154_p8 }
 0xbf5   : > { %v1926_v0 = vpop.permute.xlu1 %1925 }
 0xbf6   : > { %v1936_v41 = vsel %vm814_vm2, %v1920_v39, %v1926_v0 }
 0xbf9   : > { %v1930_v40 = vpop.permute.xlu0 %1929 }
 0xbfa   : > { %v1937_v42 = vsel %vm1251_vm4, %v1936_v41, %v1930_v40 }
 0xc01   : > { %v1934_v43 = vpop.permute.xlu1 %1933 }
 0xc02   : > { %v1938_v44 = vsel %vm1253_vm5, %v1937_v42, %v1934_v43 }
 0xc03   : > { %v1939_v45 = vpack.c.bf16 %v1938_v44, %v1938_v44 }
 0xc05   : > { %2614 = vmatmul.mubr.msk.bf16.vlgmr.msra.gmra.mxu0 %vm679_vm0, %v1939_v45 }
 0xc06   : > { %2633 = vmatprep.mubr.msk.bf16.mxu0 %vm3257_vm1, %v3256_v24  ;;  %2626 = vmatpush3.bf16.msra.mxu0 %v2817_v62 }
 0xc07   : > { %2627 = vmatprep.subr.bf16.mxu0 %v3256_v24 }
 0xc0a   : > { %2628 = vmatpush3.bf16.msra.mxu0 %v2818_v63 }
 0xc0b   : > { %2629 = vmatprep.subr.bf16.mxu0 %v3256_v24 }
 0xc0e   : > { %2630 = vmatpush3.bf16.msra.mxu0 %v2819_v1 }
 0xc0f   : > { %2631 = vmatprep.subr.bf16.mxu0 %v3256_v24 }
 0xc12   : > { %2632 = vmatpush3.bf16.msra.mxu0 %v2820_v2 }
 0xcc5   : > { %v1993_v46 = vpop.f32.mrf.mxu0 }
 0xcc6   : > { %v1999_v47 = vadd.f32 %v1993_v46, %v3724_v29 }
 0xcc7   : > { %v2615_v48 = vpop.f32.mrf.mxu0 }
 0xcc8   : > { %v2001_v49 = vmul.f32 %v1999_v47, %v1999_v47 }
 0xcc9   : > { %v1996_v50 = vpop.f32.mrf.mxu0 }
 0xcca   : > { %v2002_v51 = vsel %vm679_vm0, %v2001_v49, 0.0 }
 0xccb   : > { %2003 = vadd.xlane.f32.xlu1 %v2002_v51  ;;  %v2616_v52 = vpop.f32.mrf.mxu0 }
 0xd54   : > { %v2004_v29 = vpop.xlane.xlu1 %2003 }
 0xd55   : > { %v2005_v55 = vmul.f32 0.03125, %v2004_v29 }
 0xd57   : > { %v2006_v56 = vadd.f32 1e-05, %v2005_v55 }
 0xd59   : > { %2857 = vrsqrt.f32 %v2006_v56 }
 0xd66   : > { %v2858_v57 = vpop.eup %2857 }
 0xd67   : > { %v2008_v59 = vmul.f32 %v2858_v57, %v1999_v47 }
 0xd69   : > { %v2013_v60 = vmul.f32 %v2422_v58, %v2008_v59 }
 0xd6b   : > { %v2014_v61 = vpack.c.bf16 %v2013_v60, %v2013_v60 }
 0xd6d   : > { %2622 = vmatmul.mubr.msk.bf16.vlgmr.msra.gmra.mxu1 %vm679_vm0, %v2014_v61 }
 0xe2d   : > { %v2068_v3 = vpop.f32.mrf.mxu1 }
 0xe2e   : > { %2082 = vrot.lane.b32.xlu0 %v2068_v3, %s3253_s27  ;;  %v2426_v7 = vmul.f32 -1.442695, %v2068_v3  ;;  %s2433_s27 = sshll.u32 %s3366_s24, 7  ;;  %s2166_s24 = scalar_lea.sflag [#allocation4], %s3569_s13 }
 0xe2f   : > { %v2623_v4 = vpop.f32.mrf.mxu1  ;;  %s3840_s26 = scalar_lea.hbm %s3957_s28, %s2433_s27 }
 0xe30   : > { %2859 = vpow2.f32 %v2426_v7 }
 0xe31   : > { %v2071_v5 = vpop.f32.mrf.mxu1 }
 0xe33   : > { %v2624_v6 = vpop.f32.mrf.mxu1 }
 0xe3d   : > { %v2860_v9 = vpop.eup %2859 }
 0xe3e   : > { %v2077_v10 = vadd.f32 1.0, %v2860_v9 }
 0xe40   : > { %2861 = vrcp.f32 %v2077_v10 }
 0xe4d   : > { %v2862_v11 = vpop.eup %2861 }
 0xe4e   : > { %v2080_v24 = vmul.f32 %v2862_v11, %v2068_v3 }
 0xea0   : > { %v2083_v12 = vpop.permute.xlu0 %2082 }
 0xea1   : > { %v2085_v30 = vmul.f32 %v2083_v12, %v2080_v24 }
 0xea3   : > { %v2086_v8 = vpack.c.bf16 %v2085_v30, %v2085_v30 }
 0xea5   : > { %2634 = vmatmul.mubr.msk.bf16.vlgmr.msra.gmra.mxu0 %vm2119_vm6, %v2086_v8 }
 0xf65   : > { %v2157_v13 = vpop.f32.mrf.mxu0 }
 0xf66   : > { %v2163_v14 = vadd.f32 %v2157_v13, %v1999_v47 }
 0xf67   : > { %v2635_v15 = vpop.f32.mrf.mxu0 }
 0xf68   : > { %2164 = vst.msk [vmem:[%s662_s23] sm:$0xff] %vm679_vm0, %v2163_v14 }
 0xf69   : > { %v2160_v16 = vpop.f32.mrf.mxu0 }
 0xf6a   : > { %3164 = shalt.err (!%p3161_p3)
}
 0xf6b   : > { %s3165_s8 = scalar_lea.hbm %s3840_s26, 128  ;;  %s3169_s25 = scalar_lea.hbm %s3957_s28, 256 }
 0xf6c   : > { %p3166_p4 = scmp.ne.s32.totalorder %s3840_s26, %s3165_s8  ;;  %p3170_p2 = scmp.lt.s32.totalorder %s3840_s26, %s3957_s28 }
 0xf6d   : > { %p3171_p5 = scmp.lt.s32.totalorder %s3169_s25, %s3165_s8 }
 0xf6e   : > { %p3167_p13 = pnand %p3166_p4, %p3958_p7 }
 0xf6f   : > { %p3172_p10 = por %p3171_p5, %p3170_p2 }
 0xf70   : > { %p3168_p0 = pneg %p3167_p13 }
 0xf72   : > { %p3173_p12 = pnand %p3172_p10, %p3168_p0 }
 0xf74   : > { %3176 = shalt.err (!%p3173_p12)
}
 0xf75   : > { %2679 = dma.vmem_to_hbm [thread:$0]  (%p3958_p7), %s3842_s5, 128, %s3840_s26, %s2166_s24   ;;  %v2636_v17 = vpop.f32.mrf.mxu0 }
 0xf76 PF: > { %s2191_s27 = sand.u32 1, %s3223_s18   ;;  %p3959_p6 = scmp.ne.s32.totalorder %s3943_s29, 0 }
 0xf77   : > { %p3960_p8 = scmp.ge.s32.totalorder %s3235_s21, 2  ;;  %s2192_s23 = scalar_lea.sflag [#allocation4], %s2191_s27 }
 0xf79   : > { %p2717_p9 = pnand %p3960_p8, %p3959_p6 }
 0xf7b   : > { %p2718_p11 = pneg %p2717_p9 }
 0xf7d   : > { %3218 = dma.done.wait (%p2718_p11), %s2192_s23, 128  }
 0xf7e   : > { %3220 = vsyncadd (%p2718_p11), %s2192_s23, 4294967168  ;;  %p33_p1 = scmp.ge.s32.totalorder %s3494_s16, 4   ;;  %s3961_s18 = smov %s3227_s19 }
 0xf7f   : > { %s3962_s19 = smov %s3231_s20  ;;  %s3963_s20 = smov %s3505_s2 }
 0xf80   : > { %s3964_s21 = smov %s3494_s16  ;;  %35 = sbr.rel (!%p33_p1) target bundleno = 22 (0x16), region = 168 }
 0xf85   :  { %2197 = vsyncpa [#allocation3], 1 }
 0xf86   :  { %2199 = vsyncpa [#allocation3 + $0x1], 1 }
 0xf87   :  { %2200 = vsyncpa [#allocation6], 1 }
 0xf88   :  { %2201 = vsyncpa [#allocation9], 1 }
 0xf89   :  { %2202 = vsyncpa [#allocation12], 1 }
 0xf8a   :  { %2203 = vsyncpa [#allocation15], 1 }
 0xf8b   :  { %2204 = vsyncpa [#allocation18], 1 }
 0xf8c   :  { %2205 = vsyncpa [#allocation4], 1 }
 0xf8d   :  { %2207 = vsyncpa [#allocation4 + $0x1], 1 }

</bundles_post_ra>
